<compile_context>
chip_gen: v5e
topology: v5e:2x2
jax: 0.10.0
libtpu: 0.0.40
codegen_flags: <defaults>
</compile_context>

<pallas_src>
import functools

import jax
import jax.numpy as jnp
from jax.experimental import pallas as pl
from jax.experimental.pallas import tpu as pltpu

SOS_TOKEN = 0
MAX_LENGTH = 8


def _decoder_kernel(
    # inputs (all VMEM-resident, full arrays; no grid)
    enc_hid_ref,    # (B, H)          f32   initial hidden state
    emb_ih_ref,     # (Vpad, 3H)      bf16  relu(emb) @ w_ih + b_ih, padded rows = 0
    w_fused_ref,    # (H, Vpad+3H)    bf16  [out_w | w_hh], out_w padded cols = 0
    b_fused_ref,    # (1, Vpad+3H)    f32   [out_b | b_hh], out_b padded cols = -1e30
    # outputs
    dec_out_ref,    # (MAX_LENGTH*B, Vpad) f32  per-step log-softmax, lane-dense slab
    hid_out_ref,    # (B, H)               f32  final hidden state
    *, B, H, Vpad, max_length,
):
    H3 = 3 * H

    # ---- hoist loop invariants: weights, iotas, bias broadcasts (built once) ----
    h = enc_hid_ref[...]                                   # (B, H) f32
    emb_ih = emb_ih_ref[...]                               # (Vpad, 3H) bf16
    w_fused = w_fused_ref[...]                             # (H, Vpad+3H) bf16
    b_fused = jnp.broadcast_to(b_fused_ref[...], (B, Vpad + H3))   # hoisted broadcast

    pad_iota = jax.lax.broadcasted_iota(jnp.int32, (B, Vpad), 1)   # one-hot + argmax

    # epilogue-only views (lane-tile-aligned slices of the fused weight/bias)
    out_w = w_fused[:, :Vpad]                              # (H, Vpad) bf16
    out_b = b_fused[:, :Vpad]                              # (B, Vpad) f32

    def gru_update(gi, gh, h_prev):
        # PyTorch gate order r, z, n ; one 2H-wide sigmoid + one tanh per step.
        rz = jax.nn.sigmoid(gi[:, :2 * H] + gh[:, :2 * H])
        r = rz[:, :H]
        z = rz[:, H:2 * H]
        n = jnp.tanh(gi[:, 2 * H:] + r * gh[:, 2 * H:])
        return (1.0 - z) * n + z * h_prev

    def logsoftmax_and_tok(logits):
        lmax = jnp.max(logits, axis=-1, keepdims=True)
        # greedy token = argmax with min-index tie-break (matches torch.topk(1));
        # padded columns are -1e30 so they can never be selected.
        tok = jnp.min(
            jnp.where(logits >= lmax, pad_iota, Vpad), axis=-1, keepdims=True
        ).astype(jnp.int32)
        # padded columns contribute exp(-1e30 - lmax) == 0 exactly in f32.
        lse = jnp.log(jnp.sum(jnp.exp(logits - lmax), axis=-1, keepdims=True)) + lmax
        return logits - lse, tok

    step_logprobs = []

    # ---- step 0: token is SOS; no previous-step logits to emit yet ----
    onehot = (pad_iota == SOS_TOKEN).astype(jnp.bfloat16)                     # (B, Vpad)
    gi = jnp.dot(onehot, emb_ih, preferred_element_type=jnp.float32)          # (B, 3H) f32
    fused = jnp.dot(h.astype(jnp.bfloat16), w_fused,
                    preferred_element_type=jnp.float32) + b_fused             # (B, Vpad+3H)
    h = gru_update(gi, fused[:, Vpad:], h)

    # ---- steps 1..max_length-1: fused matmul yields [logits_{s-1} | gh_s] ----
    # Static Python loop == fully unrolled (max_length is a small compile-time const).
    for _ in range(1, max_length):
        fused = jnp.dot(h.astype(jnp.bfloat16), w_fused,
                        preferred_element_type=jnp.float32) + b_fused
        logp, tok = logsoftmax_and_tok(fused[:, :Vpad])                       # step s-1
        step_logprobs.append(logp)
        onehot = (pad_iota == tok).astype(jnp.bfloat16)
        gi = jnp.dot(onehot, emb_ih, preferred_element_type=jnp.float32)
        h = gru_update(gi, fused[:, Vpad:], h)

    # ---- epilogue: logits / log-softmax for the final step ----
    logits = jnp.dot(h.astype(jnp.bfloat16), out_w,
                     preferred_element_type=jnp.float32) + out_b              # (B, Vpad)
    logp, _ = logsoftmax_and_tok(logits)
    step_logprobs.append(logp)

    # single unmasked lane-dense slab store (max_length*B, Vpad); hidden written once.
    dec_out_ref[...] = jnp.concatenate(step_logprobs, axis=0)
    hid_out_ref[...] = h


def decoder_rnn_forward(encoder_outputs, encoder_hidden, params, max_length=MAX_LENGTH):
    """Full greedy decoding loop of DecoderRNN in one Pallas kernel invocation."""
    B = encoder_outputs.shape[0]          # encoder_outputs only supplies batch size
    H = encoder_hidden.shape[-1]
    V = params["out_b"].shape[-1]
    enc_hid = encoder_hidden.reshape(B, H).astype(jnp.float32)

    # lane-dense vocab padding (multiple of 128)
    v_pad = max(128, ((V + 127) // 128) * 128)
    pad = v_pad - V

    # fold embedding + ReLU + GRU input projection (+ b_ih) into one table;
    # exact because the one-hot selects exactly one row per step.
    emb_ih = jnp.maximum(params["emb"], 0.0) @ params["w_ih"] + params["b_ih"]   # (V, 3H)
    emb_ih_pad = jnp.pad(emb_ih, ((0, pad), (0, 0))).astype(jnp.bfloat16)        # (Vpad, 3H)

    # fused RHS [out_w | w_hh]; out_w padded cols are 0, out_b padded cols -1e30
    out_w = jnp.pad(params["out_w"], ((0, 0), (0, pad)))                         # (H, Vpad)
    out_b = jnp.pad(params["out_b"], ((0, 0), (0, pad)), constant_values=-1e30)  # (1, Vpad)
    w_fused = jnp.concatenate([out_w, params["w_hh"]], axis=1).astype(jnp.bfloat16)
    b_fused = jnp.concatenate([out_b, params["b_hh"]], axis=1).astype(jnp.float32)

    kernel = functools.partial(
        _decoder_kernel, B=B, H=H, Vpad=v_pad, max_length=max_length
    )

    vmem = pl.BlockSpec(memory_space=pltpu.MemorySpace.VMEM)
    dec_out_flat, hid_out = pl.pallas_call(
        kernel,
        out_shape=(
            jax.ShapeDtypeStruct((max_length * B, v_pad), jnp.float32),
            jax.ShapeDtypeStruct((B, H), jnp.float32),
        ),
        in_specs=[vmem] * 4,
        out_specs=(vmem, vmem),
    )(enc_hid, emb_ih_pad, w_fused, b_fused)

    # (max_length*B, Vpad) -> (B, max_length, V); cheap XLA-side layout plumbing.
    decoder_outputs = (
        dec_out_flat.reshape(max_length, B, v_pad).transpose(1, 0, 2)[:, :, :V]
    )
    decoder_hidden = hid_out[None, :, :]          # (1, B, H)
    return decoder_outputs, decoder_hidden, None  # DecoderRNN returns attentions=None


def init_params(key, hidden_size, output_size):
    """Deterministic synthetic parameters with PyTorch-equivalent shapes,
    pre-transposed so the kernel computes x @ W directly."""
    H, V = hidden_size, output_size
    ks = jax.random.split(key, 6)

    def u(k, shape, fan_in):
        bound = 1.0 / jnp.sqrt(jnp.float32(fan_in))
        return jax.random.uniform(k, shape, jnp.float32, -bound, bound)

    return {
        "emb":   jax.random.normal(ks[0], (V, H), jnp.float32),  # nn.Embedding(V, H).weight
        "w_ih":  u(ks[1], (H, 3 * H), H),                        # gru.weight_ih_l0.T (r,z,n)
        "b_ih":  u(ks[2], (1, 3 * H), H),
        "w_hh":  u(ks[3], (H, 3 * H), H),                        # gru.weight_hh_l0.T
        "b_hh":  u(ks[4], (1, 3 * H), H),
        "out_w": u(ks[5], (H, V), H),                            # out.weight.T
        "out_b": jnp.zeros((1, V), jnp.float32),
    }


if __name__ == "__main__":
    B, S, H, V = 4, 8, 32, 32

    key = jax.random.PRNGKey(0)
    k_enc, k_hid, k_par = jax.random.split(key, 3)

    encoder_outputs = jax.random.normal(k_enc, (B, S, H), jnp.float32)
    encoder_hidden = jax.random.normal(k_hid, (1, B, H), jnp.float32)
    params = init_params(k_par, H, V)

    fwd = jax.jit(decoder_rnn_forward)
    dec_out, dec_hid, attn = fwd(encoder_outputs, encoder_hidden, params)
    jax.block_until_ready((dec_out, dec_hid))

    assert dec_out.shape == (B, MAX_LENGTH, V)
    assert dec_hid.shape == (1, B, H)
    assert attn is None
    assert bool(jnp.all(jnp.isfinite(dec_out)))
    assert bool(jnp.all(jnp.isfinite(dec_hid)))
    # log-softmax rows must normalize to 1 when exponentiated
    assert bool(jnp.allclose(jnp.sum(jnp.exp(dec_out), axis=-1), 1.0, atol=1e-3))

    print("KERNEL_OK")
</pallas_src>

<mosaic_0001>
module attributes {stable_mosaic.version = 11 : i64} {
  func.func @_decoder_kernel(%arg0: memref<4x32xf32, #tpu.memory_space<vmem>>, %arg1: memref<128x96xbf16, #tpu.memory_space<vmem>>, %arg2: memref<32x224xbf16, #tpu.memory_space<vmem>>, %arg3: memref<1x224xf32, #tpu.memory_space<vmem>>, %arg4: memref<32x128xf32, #tpu.memory_space<vmem>>, %arg5: memref<4x32xf32, #tpu.memory_space<vmem>>) attributes {dimension_semantics = [], scalar_prefetch = 0 : i64, scratch_operands = 0 : i64, tpu.core_type = #tpu.core_type<tc>} {
    %c0 = arith.constant 0 : index
    %c0_0 = arith.constant 0 : index
    %0 = vector.load %arg0[%c0, %c0_0] : memref<4x32xf32, #tpu.memory_space<vmem>>, vector<4x32xf32>
    %c0_1 = arith.constant 0 : index
    %c0_2 = arith.constant 0 : index
    %1 = vector.load %arg1[%c0_1, %c0_2] : memref<128x96xbf16, #tpu.memory_space<vmem>>, vector<128x96xbf16>
    %c0_3 = arith.constant 0 : index
    %c0_4 = arith.constant 0 : index
    %2 = vector.load %arg2[%c0_3, %c0_4] : memref<32x224xbf16, #tpu.memory_space<vmem>>, vector<32x224xbf16>
    %c0_5 = arith.constant 0 : index
    %c0_6 = arith.constant 0 : index
    %3 = vector.load %arg3[%c0_5, %c0_6] : memref<1x224xf32, #tpu.memory_space<vmem>>, vector<1x224xf32>
    %4 = vector.shape_cast %3 : vector<1x224xf32> to vector<1x224xf32>
    %5 = vector.broadcast %4 : vector<1x224xf32> to vector<4x224xf32>
    %6 = tpu.iota {dimensions = array<i32: 1>} : vector<4x128xi32>
    %7 = vector.extract_strided_slice %2 {offsets = [0, 0], sizes = [32, 128], strides = [1, 1]} : vector<32x224xbf16> to vector<32x128xbf16>
    %8 = vector.extract_strided_slice %5 {offsets = [0, 0], sizes = [4, 128], strides = [1, 1]} : vector<4x224xf32> to vector<4x128xf32>
    %c0_i32 = arith.constant 0 : i32
    %9 = vector.broadcast %c0_i32 : i32 to vector<4x128xi32>
    %10 = arith.cmpi eq, %6, %9 : vector<4x128xi32>
    %11 = arith.extui %10 : vector<4x128xi1> to vector<4x128xi32>
    %12 = arith.sitofp %11 : vector<4x128xi32> to vector<4x128xf32>
    %13 = arith.truncf %12 : vector<4x128xf32> to vector<4x128xbf16>
    %cst = arith.constant dense<0.000000e+00> : vector<4x96xf32>
    %14 = tpu.matmul %13, %1, %cst {dimension_numbers = #tpu.dot_dimension_numbers<[1], [0], [0], [1], [0, 0, 1, 1], [], []>} : vector<4x128xbf16>, vector<128x96xbf16>, vector<4x96xf32> -> vector<4x96xf32>
    %15 = arith.truncf %0 : vector<4x32xf32> to vector<4x32xbf16>
    %cst_7 = arith.constant dense<0.000000e+00> : vector<4x224xf32>
    %16 = tpu.matmul %15, %2, %cst_7 {dimension_numbers = #tpu.dot_dimension_numbers<[1], [0], [0], [1], [0, 0, 1, 1], [], []>} : vector<4x32xbf16>, vector<32x224xbf16>, vector<4x224xf32> -> vector<4x224xf32>
    %17 = arith.addf %16, %5 : vector<4x224xf32>
    %18 = vector.extract_strided_slice %17 {offsets = [0, 128], sizes = [4, 96], strides = [1, 1]} : vector<4x224xf32> to vector<4x96xf32>
    %19 = vector.extract_strided_slice %14 {offsets = [0, 0], sizes = [4, 64], strides = [1, 1]} : vector<4x96xf32> to vector<4x64xf32>
    %20 = vector.extract_strided_slice %18 {offsets = [0, 0], sizes = [4, 64], strides = [1, 1]} : vector<4x96xf32> to vector<4x64xf32>
    %21 = arith.addf %19, %20 : vector<4x64xf32>
    %22 = arith.negf %21 : vector<4x64xf32>
    %23 = math.exp %22 : vector<4x64xf32>
    %cst_8 = arith.constant 1.000000e+00 : f32
    %24 = vector.broadcast %cst_8 : f32 to vector<4x64xf32>
    %25 = arith.addf %24, %23 : vector<4x64xf32>
    %26 = arith.divf %24, %25 : vector<4x64xf32>
    %27 = vector.extract_strided_slice %26 {offsets = [0, 0], sizes = [4, 32], strides = [1, 1]} : vector<4x64xf32> to vector<4x32xf32>
    %28 = vector.extract_strided_slice %26 {offsets = [0, 32], sizes = [4, 32], strides = [1, 1]} : vector<4x64xf32> to vector<4x32xf32>
    %29 = vector.extract_strided_slice %14 {offsets = [0, 64], sizes = [4, 32], strides = [1, 1]} : vector<4x96xf32> to vector<4x32xf32>
    %30 = vector.extract_strided_slice %18 {offsets = [0, 64], sizes = [4, 32], strides = [1, 1]} : vector<4x96xf32> to vector<4x32xf32>
    %31 = arith.mulf %27, %30 : vector<4x32xf32>
    %32 = arith.addf %29, %31 : vector<4x32xf32>
    %33 = math.tanh %32 : vector<4x32xf32>
    %cst_9 = arith.constant 1.000000e+00 : f32
    %34 = vector.broadcast %cst_9 : f32 to vector<4x32xf32>
    %35 = arith.subf %34, %28 : vector<4x32xf32>
    %36 = arith.mulf %35, %33 : vector<4x32xf32>
    %37 = arith.mulf %28, %0 : vector<4x32xf32>
    %38 = arith.addf %36, %37 : vector<4x32xf32>
    %39 = arith.truncf %38 : vector<4x32xf32> to vector<4x32xbf16>
    %cst_10 = arith.constant dense<0.000000e+00> : vector<4x224xf32>
    %40 = tpu.matmul %39, %2, %cst_10 {dimension_numbers = #tpu.dot_dimension_numbers<[1], [0], [0], [1], [0, 0, 1, 1], [], []>} : vector<4x32xbf16>, vector<32x224xbf16>, vector<4x224xf32> -> vector<4x224xf32>
    %41 = arith.addf %40, %5 : vector<4x224xf32>
    %42 = vector.extract_strided_slice %41 {offsets = [0, 0], sizes = [4, 128], strides = [1, 1]} : vector<4x224xf32> to vector<4x128xf32>
    %cst_11 = arith.constant dense<0xFF800000> : vector<4xf32>
    %43 = vector.multi_reduction <maximumf>, %42, %cst_11 [1] : vector<4x128xf32> to vector<4xf32>
    %44 = vector.shape_cast %43 : vector<4xf32> to vector<4x1xf32>
    %45 = vector.broadcast %44 : vector<4x1xf32> to vector<4x128xf32>
    %46 = arith.cmpf oge, %42, %45 : vector<4x128xf32>
    %c128_i32 = arith.constant 128 : i32
    %47 = vector.broadcast %c128_i32 : i32 to vector<4x128xi32>
    %48 = arith.select %46, %6, %47 : vector<4x128xi1>, vector<4x128xi32>
    %cst_12 = arith.constant dense<2147483647> : vector<4xi32>
    %49 = vector.multi_reduction <minsi>, %48, %cst_12 [1] : vector<4x128xi32> to vector<4xi32>
    %50 = vector.shape_cast %49 : vector<4xi32> to vector<4x1xi32>
    %51 = vector.broadcast %44 : vector<4x1xf32> to vector<4x128xf32>
    %52 = arith.subf %42, %51 : vector<4x128xf32>
    %53 = math.exp %52 : vector<4x128xf32>
    %cst_13 = arith.constant dense<0.000000e+00> : vector<4xf32>
    %54 = vector.multi_reduction <add>, %53, %cst_13 [1] : vector<4x128xf32> to vector<4xf32>
    %55 = vector.shape_cast %54 : vector<4xf32> to vector<4x1xf32>
    %56 = math.log %55 : vector<4x1xf32>
    %57 = arith.addf %56, %44 : vector<4x1xf32>
    %58 = vector.broadcast %57 : vector<4x1xf32> to vector<4x128xf32>
    %59 = arith.subf %42, %58 : vector<4x128xf32>
    %60 = vector.broadcast %50 : vector<4x1xi32> to vector<4x128xi32>
    %61 = arith.cmpi eq, %6, %60 : vector<4x128xi32>
    %62 = arith.extui %61 : vector<4x128xi1> to vector<4x128xi32>
    %63 = arith.sitofp %62 : vector<4x128xi32> to vector<4x128xf32>
    %64 = arith.truncf %63 : vector<4x128xf32> to vector<4x128xbf16>
    %cst_14 = arith.constant dense<0.000000e+00> : vector<4x96xf32>
    %65 = tpu.matmul %64, %1, %cst_14 {dimension_numbers = #tpu.dot_dimension_numbers<[1], [0], [0], [1], [0, 0, 1, 1], [], []>} : vector<4x128xbf16>, vector<128x96xbf16>, vector<4x96xf32> -> vector<4x96xf32>
    %66 = vector.extract_strided_slice %41 {offsets = [0, 128], sizes = [4, 96], strides = [1, 1]} : vector<4x224xf32> to vector<4x96xf32>
    %67 = vector.extract_strided_slice %65 {offsets = [0, 0], sizes = [4, 64], strides = [1, 1]} : vector<4x96xf32> to vector<4x64xf32>
    %68 = vector.extract_strided_slice %66 {offsets = [0, 0], sizes = [4, 64], strides = [1, 1]} : vector<4x96xf32> to vector<4x64xf32>
    %69 = arith.addf %67, %68 : vector<4x64xf32>
    %70 = arith.negf %69 : vector<4x64xf32>
    %71 = math.exp %70 : vector<4x64xf32>
    %cst_15 = arith.constant 1.000000e+00 : f32
    %72 = vector.broadcast %cst_15 : f32 to vector<4x64xf32>
    %73 = arith.addf %72, %71 : vector<4x64xf32>
    %74 = arith.divf %72, %73 : vector<4x64xf32>
    %75 = vector.extract_strided_slice %74 {offsets = [0, 0], sizes = [4, 32], strides = [1, 1]} : vector<4x64xf32> to vector<4x32xf32>
    %76 = vector.extract_strided_slice %74 {offsets = [0, 32], sizes = [4, 32], strides = [1, 1]} : vector<4x64xf32> to vector<4x32xf32>
    %77 = vector.extract_strided_slice %65 {offsets = [0, 64], sizes = [4, 32], strides = [1, 1]} : vector<4x96xf32> to vector<4x32xf32>
    %78 = vector.extract_strided_slice %66 {offsets = [0, 64], sizes = [4, 32], strides = [1, 1]} : vector<4x96xf32> to vector<4x32xf32>
    %79 = arith.mulf %75, %78 : vector<4x32xf32>
    %80 = arith.addf %77, %79 : vector<4x32xf32>
    %81 = math.tanh %80 : vector<4x32xf32>
    %cst_16 = arith.constant 1.000000e+00 : f32
    %82 = vector.broadcast %cst_16 : f32 to vector<4x32xf32>
    %83 = arith.subf %82, %76 : vector<4x32xf32>
    %84 = arith.mulf %83, %81 : vector<4x32xf32>
    %85 = arith.mulf %76, %38 : vector<4x32xf32>
    %86 = arith.addf %84, %85 : vector<4x32xf32>
    %87 = arith.truncf %86 : vector<4x32xf32> to vector<4x32xbf16>
    %cst_17 = arith.constant dense<0.000000e+00> : vector<4x224xf32>
    %88 = tpu.matmul %87, %2, %cst_17 {dimension_numbers = #tpu.dot_dimension_numbers<[1], [0], [0], [1], [0, 0, 1, 1], [], []>} : vector<4x32xbf16>, vector<32x224xbf16>, vector<4x224xf32> -> vector<4x224xf32>
    %89 = arith.addf %88, %5 : vector<4x224xf32>
    %90 = vector.extract_strided_slice %89 {offsets = [0, 0], sizes = [4, 128], strides = [1, 1]} : vector<4x224xf32> to vector<4x128xf32>
    %cst_18 = arith.constant dense<0xFF800000> : vector<4xf32>
    %91 = vector.multi_reduction <maximumf>, %90, %cst_18 [1] : vector<4x128xf32> to vector<4xf32>
    %92 = vector.shape_cast %91 : vector<4xf32> to vector<4x1xf32>
    %93 = vector.broadcast %92 : vector<4x1xf32> to vector<4x128xf32>
    %94 = arith.cmpf oge, %90, %93 : vector<4x128xf32>
    %c128_i32_19 = arith.constant 128 : i32
    %95 = vector.broadcast %c128_i32_19 : i32 to vector<4x128xi32>
    %96 = arith.select %94, %6, %95 : vector<4x128xi1>, vector<4x128xi32>
    %cst_20 = arith.constant dense<2147483647> : vector<4xi32>
    %97 = vector.multi_reduction <minsi>, %96, %cst_20 [1] : vector<4x128xi32> to vector<4xi32>
    %98 = vector.shape_cast %97 : vector<4xi32> to vector<4x1xi32>
    %99 = vector.broadcast %92 : vector<4x1xf32> to vector<4x128xf32>
    %100 = arith.subf %90, %99 : vector<4x128xf32>
    %101 = math.exp %100 : vector<4x128xf32>
    %cst_21 = arith.constant dense<0.000000e+00> : vector<4xf32>
    %102 = vector.multi_reduction <add>, %101, %cst_21 [1] : vector<4x128xf32> to vector<4xf32>
    %103 = vector.shape_cast %102 : vector<4xf32> to vector<4x1xf32>
    %104 = math.log %103 : vector<4x1xf32>
    %105 = arith.addf %104, %92 : vector<4x1xf32>
    %106 = vector.broadcast %105 : vector<4x1xf32> to vector<4x128xf32>
    %107 = arith.subf %90, %106 : vector<4x128xf32>
    %108 = vector.broadcast %98 : vector<4x1xi32> to vector<4x128xi32>
    %109 = arith.cmpi eq, %6, %108 : vector<4x128xi32>
    %110 = arith.extui %109 : vector<4x128xi1> to vector<4x128xi32>
    %111 = arith.sitofp %110 : vector<4x128xi32> to vector<4x128xf32>
    %112 = arith.truncf %111 : vector<4x128xf32> to vector<4x128xbf16>
    %cst_22 = arith.constant dense<0.000000e+00> : vector<4x96xf32>
    %113 = tpu.matmul %112, %1, %cst_22 {dimension_numbers = #tpu.dot_dimension_numbers<[1], [0], [0], [1], [0, 0, 1, 1], [], []>} : vector<4x128xbf16>, vector<128x96xbf16>, vector<4x96xf32> -> vector<4x96xf32>
    %114 = vector.extract_strided_slice %89 {offsets = [0, 128], sizes = [4, 96], strides = [1, 1]} : vector<4x224xf32> to vector<4x96xf32>
    %115 = vector.extract_strided_slice %113 {offsets = [0, 0], sizes = [4, 64], strides = [1, 1]} : vector<4x96xf32> to vector<4x64xf32>
    %116 = vector.extract_strided_slice %114 {offsets = [0, 0], sizes = [4, 64], strides = [1, 1]} : vector<4x96xf32> to vector<4x64xf32>
    %117 = arith.addf %115, %116 : vector<4x64xf32>
    %118 = arith.negf %117 : vector<4x64xf32>
    %119 = math.exp %118 : vector<4x64xf32>
    %cst_23 = arith.constant 1.000000e+00 : f32
    %120 = vector.broadcast %cst_23 : f32 to vector<4x64xf32>
    %121 = arith.addf %120, %119 : vector<4x64xf32>
    %122 = arith.divf %120, %121 : vector<4x64xf32>
    %123 = vector.extract_strided_slice %122 {offsets = [0, 0], sizes = [4, 32], strides = [1, 1]} : vector<4x64xf32> to vector<4x32xf32>
    %124 = vector.extract_strided_slice %122 {offsets = [0, 32], sizes = [4, 32], strides = [1, 1]} : vector<4x64xf32> to vector<4x32xf32>
    %125 = vector.extract_strided_slice %113 {offsets = [0, 64], sizes = [4, 32], strides = [1, 1]} : vector<4x96xf32> to vector<4x32xf32>
    %126 = vector.extract_strided_slice %114 {offsets = [0, 64], sizes = [4, 32], strides = [1, 1]} : vector<4x96xf32> to vector<4x32xf32>
    %127 = arith.mulf %123, %126 : vector<4x32xf32>
    %128 = arith.addf %125, %127 : vector<4x32xf32>
    %129 = math.tanh %128 : vector<4x32xf32>
    %cst_24 = arith.constant 1.000000e+00 : f32
    %130 = vector.broadcast %cst_24 : f32 to vector<4x32xf32>
    %131 = arith.subf %130, %124 : vector<4x32xf32>
    %132 = arith.mulf %131, %129 : vector<4x32xf32>
    %133 = arith.mulf %124, %86 : vector<4x32xf32>
    %134 = arith.addf %132, %133 : vector<4x32xf32>
    %135 = arith.truncf %134 : vector<4x32xf32> to vector<4x32xbf16>
    %cst_25 = arith.constant dense<0.000000e+00> : vector<4x224xf32>
    %136 = tpu.matmul %135, %2, %cst_25 {dimension_numbers = #tpu.dot_dimension_numbers<[1], [0], [0], [1], [0, 0, 1, 1], [], []>} : vector<4x32xbf16>, vector<32x224xbf16>, vector<4x224xf32> -> vector<4x224xf32>
    %137 = arith.addf %136, %5 : vector<4x224xf32>
    %138 = vector.extract_strided_slice %137 {offsets = [0, 0], sizes = [4, 128], strides = [1, 1]} : vector<4x224xf32> to vector<4x128xf32>
    %cst_26 = arith.constant dense<0xFF800000> : vector<4xf32>
    %139 = vector.multi_reduction <maximumf>, %138, %cst_26 [1] : vector<4x128xf32> to vector<4xf32>
    %140 = vector.shape_cast %139 : vector<4xf32> to vector<4x1xf32>
    %141 = vector.broadcast %140 : vector<4x1xf32> to vector<4x128xf32>
    %142 = arith.cmpf oge, %138, %141 : vector<4x128xf32>
    %c128_i32_27 = arith.constant 128 : i32
    %143 = vector.broadcast %c128_i32_27 : i32 to vector<4x128xi32>
    %144 = arith.select %142, %6, %143 : vector<4x128xi1>, vector<4x128xi32>
    %cst_28 = arith.constant dense<2147483647> : vector<4xi32>
    %145 = vector.multi_reduction <minsi>, %144, %cst_28 [1] : vector<4x128xi32> to vector<4xi32>
    %146 = vector.shape_cast %145 : vector<4xi32> to vector<4x1xi32>
    %147 = vector.broadcast %140 : vector<4x1xf32> to vector<4x128xf32>
    %148 = arith.subf %138, %147 : vector<4x128xf32>
    %149 = math.exp %148 : vector<4x128xf32>
    %cst_29 = arith.constant dense<0.000000e+00> : vector<4xf32>
    %150 = vector.multi_reduction <add>, %149, %cst_29 [1] : vector<4x128xf32> to vector<4xf32>
    %151 = vector.shape_cast %150 : vector<4xf32> to vector<4x1xf32>
    %152 = math.log %151 : vector<4x1xf32>
    %153 = arith.addf %152, %140 : vector<4x1xf32>
    %154 = vector.broadcast %153 : vector<4x1xf32> to vector<4x128xf32>
    %155 = arith.subf %138, %154 : vector<4x128xf32>
    %156 = vector.broadcast %146 : vector<4x1xi32> to vector<4x128xi32>
    %157 = arith.cmpi eq, %6, %156 : vector<4x128xi32>
    %158 = arith.extui %157 : vector<4x128xi1> to vector<4x128xi32>
    %159 = arith.sitofp %158 : vector<4x128xi32> to vector<4x128xf32>
    %160 = arith.truncf %159 : vector<4x128xf32> to vector<4x128xbf16>
    %cst_30 = arith.constant dense<0.000000e+00> : vector<4x96xf32>
    %161 = tpu.matmul %160, %1, %cst_30 {dimension_numbers = #tpu.dot_dimension_numbers<[1], [0], [0], [1], [0, 0, 1, 1], [], []>} : vector<4x128xbf16>, vector<128x96xbf16>, vector<4x96xf32> -> vector<4x96xf32>
    %162 = vector.extract_strided_slice %137 {offsets = [0, 128], sizes = [4, 96], strides = [1, 1]} : vector<4x224xf32> to vector<4x96xf32>
    %163 = vector.extract_strided_slice %161 {offsets = [0, 0], sizes = [4, 64], strides = [1, 1]} : vector<4x96xf32> to vector<4x64xf32>
    %164 = vector.extract_strided_slice %162 {offsets = [0, 0], sizes = [4, 64], strides = [1, 1]} : vector<4x96xf32> to vector<4x64xf32>
    %165 = arith.addf %163, %164 : vector<4x64xf32>
    %166 = arith.negf %165 : vector<4x64xf32>
    %167 = math.exp %166 : vector<4x64xf32>
    %cst_31 = arith.constant 1.000000e+00 : f32
    %168 = vector.broadcast %cst_31 : f32 to vector<4x64xf32>
    %169 = arith.addf %168, %167 : vector<4x64xf32>
    %170 = arith.divf %168, %169 : vector<4x64xf32>
    %171 = vector.extract_strided_slice %170 {offsets = [0, 0], sizes = [4, 32], strides = [1, 1]} : vector<4x64xf32> to vector<4x32xf32>
    %172 = vector.extract_strided_slice %170 {offsets = [0, 32], sizes = [4, 32], strides = [1, 1]} : vector<4x64xf32> to vector<4x32xf32>
    %173 = vector.extract_strided_slice %161 {offsets = [0, 64], sizes = [4, 32], strides = [1, 1]} : vector<4x96xf32> to vector<4x32xf32>
    %174 = vector.extract_strided_slice %162 {offsets = [0, 64], sizes = [4, 32], strides = [1, 1]} : vector<4x96xf32> to vector<4x32xf32>
    %175 = arith.mulf %171, %174 : vector<4x32xf32>
    %176 = arith.addf %173, %175 : vector<4x32xf32>
    %177 = math.tanh %176 : vector<4x32xf32>
    %cst_32 = arith.constant 1.000000e+00 : f32
    %178 = vector.broadcast %cst_32 : f32 to vector<4x32xf32>
    %179 = arith.subf %178, %172 : vector<4x32xf32>
    %180 = arith.mulf %179, %177 : vector<4x32xf32>
    %181 = arith.mulf %172, %134 : vector<4x32xf32>
    %182 = arith.addf %180, %181 : vector<4x32xf32>
    %183 = arith.truncf %182 : vector<4x32xf32> to vector<4x32xbf16>
    %cst_33 = arith.constant dense<0.000000e+00> : vector<4x224xf32>
    %184 = tpu.matmul %183, %2, %cst_33 {dimension_numbers = #tpu.dot_dimension_numbers<[1], [0], [0], [1], [0, 0, 1, 1], [], []>} : vector<4x32xbf16>, vector<32x224xbf16>, vector<4x224xf32> -> vector<4x224xf32>
    %185 = arith.addf %184, %5 : vector<4x224xf32>
    %186 = vector.extract_strided_slice %185 {offsets = [0, 0], sizes = [4, 128], strides = [1, 1]} : vector<4x224xf32> to vector<4x128xf32>
    %cst_34 = arith.constant dense<0xFF800000> : vector<4xf32>
    %187 = vector.multi_reduction <maximumf>, %186, %cst_34 [1] : vector<4x128xf32> to vector<4xf32>
    %188 = vector.shape_cast %187 : vector<4xf32> to vector<4x1xf32>
    %189 = vector.broadcast %188 : vector<4x1xf32> to vector<4x128xf32>
    %190 = arith.cmpf oge, %186, %189 : vector<4x128xf32>
    %c128_i32_35 = arith.constant 128 : i32
    %191 = vector.broadcast %c128_i32_35 : i32 to vector<4x128xi32>
    %192 = arith.select %190, %6, %191 : vector<4x128xi1>, vector<4x128xi32>
    %cst_36 = arith.constant dense<2147483647> : vector<4xi32>
    %193 = vector.multi_reduction <minsi>, %192, %cst_36 [1] : vector<4x128xi32> to vector<4xi32>
    %194 = vector.shape_cast %193 : vector<4xi32> to vector<4x1xi32>
    %195 = vector.broadcast %188 : vector<4x1xf32> to vector<4x128xf32>
    %196 = arith.subf %186, %195 : vector<4x128xf32>
    %197 = math.exp %196 : vector<4x128xf32>
    %cst_37 = arith.constant dense<0.000000e+00> : vector<4xf32>
    %198 = vector.multi_reduction <add>, %197, %cst_37 [1] : vector<4x128xf32> to vector<4xf32>
    %199 = vector.shape_cast %198 : vector<4xf32> to vector<4x1xf32>
    %200 = math.log %199 : vector<4x1xf32>
    %201 = arith.addf %200, %188 : vector<4x1xf32>
    %202 = vector.broadcast %201 : vector<4x1xf32> to vector<4x128xf32>
    %203 = arith.subf %186, %202 : vector<4x128xf32>
    %204 = vector.broadcast %194 : vector<4x1xi32> to vector<4x128xi32>
    %205 = arith.cmpi eq, %6, %204 : vector<4x128xi32>
    %206 = arith.extui %205 : vector<4x128xi1> to vector<4x128xi32>
    %207 = arith.sitofp %206 : vector<4x128xi32> to vector<4x128xf32>
    %208 = arith.truncf %207 : vector<4x128xf32> to vector<4x128xbf16>
    %cst_38 = arith.constant dense<0.000000e+00> : vector<4x96xf32>
    %209 = tpu.matmul %208, %1, %cst_38 {dimension_numbers = #tpu.dot_dimension_numbers<[1], [0], [0], [1], [0, 0, 1, 1], [], []>} : vector<4x128xbf16>, vector<128x96xbf16>, vector<4x96xf32> -> vector<4x96xf32>
    %210 = vector.extract_strided_slice %185 {offsets = [0, 128], sizes = [4, 96], strides = [1, 1]} : vector<4x224xf32> to vector<4x96xf32>
    %211 = vector.extract_strided_slice %209 {offsets = [0, 0], sizes = [4, 64], strides = [1, 1]} : vector<4x96xf32> to vector<4x64xf32>
    %212 = vector.extract_strided_slice %210 {offsets = [0, 0], sizes = [4, 64], strides = [1, 1]} : vector<4x96xf32> to vector<4x64xf32>
    %213 = arith.addf %211, %212 : vector<4x64xf32>
    %214 = arith.negf %213 : vector<4x64xf32>
    %215 = math.exp %214 : vector<4x64xf32>
    %cst_39 = arith.constant 1.000000e+00 : f32
    %216 = vector.broadcast %cst_39 : f32 to vector<4x64xf32>
    %217 = arith.addf %216, %215 : vector<4x64xf32>
    %218 = arith.divf %216, %217 : vector<4x64xf32>
    %219 = vector.extract_strided_slice %218 {offsets = [0, 0], sizes = [4, 32], strides = [1, 1]} : vector<4x64xf32> to vector<4x32xf32>
    %220 = vector.extract_strided_slice %218 {offsets = [0, 32], sizes = [4, 32], strides = [1, 1]} : vector<4x64xf32> to vector<4x32xf32>
    %221 = vector.extract_strided_slice %209 {offsets = [0, 64], sizes = [4, 32], strides = [1, 1]} : vector<4x96xf32> to vector<4x32xf32>
    %222 = vector.extract_strided_slice %210 {offsets = [0, 64], sizes = [4, 32], strides = [1, 1]} : vector<4x96xf32> to vector<4x32xf32>
    %223 = arith.mulf %219, %222 : vector<4x32xf32>
    %224 = arith.addf %221, %223 : vector<4x32xf32>
    %225 = math.tanh %224 : vector<4x32xf32>
    %cst_40 = arith.constant 1.000000e+00 : f32
    %226 = vector.broadcast %cst_40 : f32 to vector<4x32xf32>
    %227 = arith.subf %226, %220 : vector<4x32xf32>
    %228 = arith.mulf %227, %225 : vector<4x32xf32>
    %229 = arith.mulf %220, %182 : vector<4x32xf32>
    %230 = arith.addf %228, %229 : vector<4x32xf32>
    %231 = arith.truncf %230 : vector<4x32xf32> to vector<4x32xbf16>
    %cst_41 = arith.constant dense<0.000000e+00> : vector<4x224xf32>
    %232 = tpu.matmul %231, %2, %cst_41 {dimension_numbers = #tpu.dot_dimension_numbers<[1], [0], [0], [1], [0, 0, 1, 1], [], []>} : vector<4x32xbf16>, vector<32x224xbf16>, vector<4x224xf32> -> vector<4x224xf32>
    %233 = arith.addf %232, %5 : vector<4x224xf32>
    %234 = vector.extract_strided_slice %233 {offsets = [0, 0], sizes = [4, 128], strides = [1, 1]} : vector<4x224xf32> to vector<4x128xf32>
    %cst_42 = arith.constant dense<0xFF800000> : vector<4xf32>
    %235 = vector.multi_reduction <maximumf>, %234, %cst_42 [1] : vector<4x128xf32> to vector<4xf32>
    %236 = vector.shape_cast %235 : vector<4xf32> to vector<4x1xf32>
    %237 = vector.broadcast %236 : vector<4x1xf32> to vector<4x128xf32>
    %238 = arith.cmpf oge, %234, %237 : vector<4x128xf32>
    %c128_i32_43 = arith.constant 128 : i32
    %239 = vector.broadcast %c128_i32_43 : i32 to vector<4x128xi32>
    %240 = arith.select %238, %6, %239 : vector<4x128xi1>, vector<4x128xi32>
    %cst_44 = arith.constant dense<2147483647> : vector<4xi32>
    %241 = vector.multi_reduction <minsi>, %240, %cst_44 [1] : vector<4x128xi32> to vector<4xi32>
    %242 = vector.shape_cast %241 : vector<4xi32> to vector<4x1xi32>
    %243 = vector.broadcast %236 : vector<4x1xf32> to vector<4x128xf32>
    %244 = arith.subf %234, %243 : vector<4x128xf32>
    %245 = math.exp %244 : vector<4x128xf32>
    %cst_45 = arith.constant dense<0.000000e+00> : vector<4xf32>
    %246 = vector.multi_reduction <add>, %245, %cst_45 [1] : vector<4x128xf32> to vector<4xf32>
    %247 = vector.shape_cast %246 : vector<4xf32> to vector<4x1xf32>
    %248 = math.log %247 : vector<4x1xf32>
    %249 = arith.addf %248, %236 : vector<4x1xf32>
    %250 = vector.broadcast %249 : vector<4x1xf32> to vector<4x128xf32>
    %251 = arith.subf %234, %250 : vector<4x128xf32>
    %252 = vector.broadcast %242 : vector<4x1xi32> to vector<4x128xi32>
    %253 = arith.cmpi eq, %6, %252 : vector<4x128xi32>
    %254 = arith.extui %253 : vector<4x128xi1> to vector<4x128xi32>
    %255 = arith.sitofp %254 : vector<4x128xi32> to vector<4x128xf32>
    %256 = arith.truncf %255 : vector<4x128xf32> to vector<4x128xbf16>
    %cst_46 = arith.constant dense<0.000000e+00> : vector<4x96xf32>
    %257 = tpu.matmul %256, %1, %cst_46 {dimension_numbers = #tpu.dot_dimension_numbers<[1], [0], [0], [1], [0, 0, 1, 1], [], []>} : vector<4x128xbf16>, vector<128x96xbf16>, vector<4x96xf32> -> vector<4x96xf32>
    %258 = vector.extract_strided_slice %233 {offsets = [0, 128], sizes = [4, 96], strides = [1, 1]} : vector<4x224xf32> to vector<4x96xf32>
    %259 = vector.extract_strided_slice %257 {offsets = [0, 0], sizes = [4, 64], strides = [1, 1]} : vector<4x96xf32> to vector<4x64xf32>
    %260 = vector.extract_strided_slice %258 {offsets = [0, 0], sizes = [4, 64], strides = [1, 1]} : vector<4x96xf32> to vector<4x64xf32>
    %261 = arith.addf %259, %260 : vector<4x64xf32>
    %262 = arith.negf %261 : vector<4x64xf32>
    %263 = math.exp %262 : vector<4x64xf32>
    %cst_47 = arith.constant 1.000000e+00 : f32
    %264 = vector.broadcast %cst_47 : f32 to vector<4x64xf32>
    %265 = arith.addf %264, %263 : vector<4x64xf32>
    %266 = arith.divf %264, %265 : vector<4x64xf32>
    %267 = vector.extract_strided_slice %266 {offsets = [0, 0], sizes = [4, 32], strides = [1, 1]} : vector<4x64xf32> to vector<4x32xf32>
    %268 = vector.extract_strided_slice %266 {offsets = [0, 32], sizes = [4, 32], strides = [1, 1]} : vector<4x64xf32> to vector<4x32xf32>
    %269 = vector.extract_strided_slice %257 {offsets = [0, 64], sizes = [4, 32], strides = [1, 1]} : vector<4x96xf32> to vector<4x32xf32>
    %270 = vector.extract_strided_slice %258 {offsets = [0, 64], sizes = [4, 32], strides = [1, 1]} : vector<4x96xf32> to vector<4x32xf32>
    %271 = arith.mulf %267, %270 : vector<4x32xf32>
    %272 = arith.addf %269, %271 : vector<4x32xf32>
    %273 = math.tanh %272 : vector<4x32xf32>
    %cst_48 = arith.constant 1.000000e+00 : f32
    %274 = vector.broadcast %cst_48 : f32 to vector<4x32xf32>
    %275 = arith.subf %274, %268 : vector<4x32xf32>
    %276 = arith.mulf %275, %273 : vector<4x32xf32>
    %277 = arith.mulf %268, %230 : vector<4x32xf32>
    %278 = arith.addf %276, %277 : vector<4x32xf32>
    %279 = arith.truncf %278 : vector<4x32xf32> to vector<4x32xbf16>
    %cst_49 = arith.constant dense<0.000000e+00> : vector<4x224xf32>
    %280 = tpu.matmul %279, %2, %cst_49 {dimension_numbers = #tpu.dot_dimension_numbers<[1], [0], [0], [1], [0, 0, 1, 1], [], []>} : vector<4x32xbf16>, vector<32x224xbf16>, vector<4x224xf32> -> vector<4x224xf32>
    %281 = arith.addf %280, %5 : vector<4x224xf32>
    %282 = vector.extract_strided_slice %281 {offsets = [0, 0], sizes = [4, 128], strides = [1, 1]} : vector<4x224xf32> to vector<4x128xf32>
    %cst_50 = arith.constant dense<0xFF800000> : vector<4xf32>
    %283 = vector.multi_reduction <maximumf>, %282, %cst_50 [1] : vector<4x128xf32> to vector<4xf32>
    %284 = vector.shape_cast %283 : vector<4xf32> to vector<4x1xf32>
    %285 = vector.broadcast %284 : vector<4x1xf32> to vector<4x128xf32>
    %286 = arith.cmpf oge, %282, %285 : vector<4x128xf32>
    %c128_i32_51 = arith.constant 128 : i32
    %287 = vector.broadcast %c128_i32_51 : i32 to vector<4x128xi32>
    %288 = arith.select %286, %6, %287 : vector<4x128xi1>, vector<4x128xi32>
    %cst_52 = arith.constant dense<2147483647> : vector<4xi32>
    %289 = vector.multi_reduction <minsi>, %288, %cst_52 [1] : vector<4x128xi32> to vector<4xi32>
    %290 = vector.shape_cast %289 : vector<4xi32> to vector<4x1xi32>
    %291 = vector.broadcast %284 : vector<4x1xf32> to vector<4x128xf32>
    %292 = arith.subf %282, %291 : vector<4x128xf32>
    %293 = math.exp %292 : vector<4x128xf32>
    %cst_53 = arith.constant dense<0.000000e+00> : vector<4xf32>
    %294 = vector.multi_reduction <add>, %293, %cst_53 [1] : vector<4x128xf32> to vector<4xf32>
    %295 = vector.shape_cast %294 : vector<4xf32> to vector<4x1xf32>
    %296 = math.log %295 : vector<4x1xf32>
    %297 = arith.addf %296, %284 : vector<4x1xf32>
    %298 = vector.broadcast %297 : vector<4x1xf32> to vector<4x128xf32>
    %299 = arith.subf %282, %298 : vector<4x128xf32>
    %300 = vector.broadcast %290 : vector<4x1xi32> to vector<4x128xi32>
    %301 = arith.cmpi eq, %6, %300 : vector<4x128xi32>
    %302 = arith.extui %301 : vector<4x128xi1> to vector<4x128xi32>
    %303 = arith.sitofp %302 : vector<4x128xi32> to vector<4x128xf32>
    %304 = arith.truncf %303 : vector<4x128xf32> to vector<4x128xbf16>
    %cst_54 = arith.constant dense<0.000000e+00> : vector<4x96xf32>
    %305 = tpu.matmul %304, %1, %cst_54 {dimension_numbers = #tpu.dot_dimension_numbers<[1], [0], [0], [1], [0, 0, 1, 1], [], []>} : vector<4x128xbf16>, vector<128x96xbf16>, vector<4x96xf32> -> vector<4x96xf32>
    %306 = vector.extract_strided_slice %281 {offsets = [0, 128], sizes = [4, 96], strides = [1, 1]} : vector<4x224xf32> to vector<4x96xf32>
    %307 = vector.extract_strided_slice %305 {offsets = [0, 0], sizes = [4, 64], strides = [1, 1]} : vector<4x96xf32> to vector<4x64xf32>
    %308 = vector.extract_strided_slice %306 {offsets = [0, 0], sizes = [4, 64], strides = [1, 1]} : vector<4x96xf32> to vector<4x64xf32>
    %309 = arith.addf %307, %308 : vector<4x64xf32>
    %310 = arith.negf %309 : vector<4x64xf32>
    %311 = math.exp %310 : vector<4x64xf32>
    %cst_55 = arith.constant 1.000000e+00 : f32
    %312 = vector.broadcast %cst_55 : f32 to vector<4x64xf32>
    %313 = arith.addf %312, %311 : vector<4x64xf32>
    %314 = arith.divf %312, %313 : vector<4x64xf32>
    %315 = vector.extract_strided_slice %314 {offsets = [0, 0], sizes = [4, 32], strides = [1, 1]} : vector<4x64xf32> to vector<4x32xf32>
    %316 = vector.extract_strided_slice %314 {offsets = [0, 32], sizes = [4, 32], strides = [1, 1]} : vector<4x64xf32> to vector<4x32xf32>
    %317 = vector.extract_strided_slice %305 {offsets = [0, 64], sizes = [4, 32], strides = [1, 1]} : vector<4x96xf32> to vector<4x32xf32>
    %318 = vector.extract_strided_slice %306 {offsets = [0, 64], sizes = [4, 32], strides = [1, 1]} : vector<4x96xf32> to vector<4x32xf32>
    %319 = arith.mulf %315, %318 : vector<4x32xf32>
    %320 = arith.addf %317, %319 : vector<4x32xf32>
    %321 = math.tanh %320 : vector<4x32xf32>
    %cst_56 = arith.constant 1.000000e+00 : f32
    %322 = vector.broadcast %cst_56 : f32 to vector<4x32xf32>
    %323 = arith.subf %322, %316 : vector<4x32xf32>
    %324 = arith.mulf %323, %321 : vector<4x32xf32>
    %325 = arith.mulf %316, %278 : vector<4x32xf32>
    %326 = arith.addf %324, %325 : vector<4x32xf32>
    %327 = arith.truncf %326 : vector<4x32xf32> to vector<4x32xbf16>
    %cst_57 = arith.constant dense<0.000000e+00> : vector<4x224xf32>
    %328 = tpu.matmul %327, %2, %cst_57 {dimension_numbers = #tpu.dot_dimension_numbers<[1], [0], [0], [1], [0, 0, 1, 1], [], []>} : vector<4x32xbf16>, vector<32x224xbf16>, vector<4x224xf32> -> vector<4x224xf32>
    %329 = arith.addf %328, %5 : vector<4x224xf32>
    %330 = vector.extract_strided_slice %329 {offsets = [0, 0], sizes = [4, 128], strides = [1, 1]} : vector<4x224xf32> to vector<4x128xf32>
    %cst_58 = arith.constant dense<0xFF800000> : vector<4xf32>
    %331 = vector.multi_reduction <maximumf>, %330, %cst_58 [1] : vector<4x128xf32> to vector<4xf32>
    %332 = vector.shape_cast %331 : vector<4xf32> to vector<4x1xf32>
    %333 = vector.broadcast %332 : vector<4x1xf32> to vector<4x128xf32>
    %334 = arith.cmpf oge, %330, %333 : vector<4x128xf32>
    %c128_i32_59 = arith.constant 128 : i32
    %335 = vector.broadcast %c128_i32_59 : i32 to vector<4x128xi32>
    %336 = arith.select %334, %6, %335 : vector<4x128xi1>, vector<4x128xi32>
    %cst_60 = arith.constant dense<2147483647> : vector<4xi32>
    %337 = vector.multi_reduction <minsi>, %336, %cst_60 [1] : vector<4x128xi32> to vector<4xi32>
    %338 = vector.shape_cast %337 : vector<4xi32> to vector<4x1xi32>
    %339 = vector.broadcast %332 : vector<4x1xf32> to vector<4x128xf32>
    %340 = arith.subf %330, %339 : vector<4x128xf32>
    %341 = math.exp %340 : vector<4x128xf32>
    %cst_61 = arith.constant dense<0.000000e+00> : vector<4xf32>
    %342 = vector.multi_reduction <add>, %341, %cst_61 [1] : vector<4x128xf32> to vector<4xf32>
    %343 = vector.shape_cast %342 : vector<4xf32> to vector<4x1xf32>
    %344 = math.log %343 : vector<4x1xf32>
    %345 = arith.addf %344, %332 : vector<4x1xf32>
    %346 = vector.broadcast %345 : vector<4x1xf32> to vector<4x128xf32>
    %347 = arith.subf %330, %346 : vector<4x128xf32>
    %348 = vector.broadcast %338 : vector<4x1xi32> to vector<4x128xi32>
    %349 = arith.cmpi eq, %6, %348 : vector<4x128xi32>
    %350 = arith.extui %349 : vector<4x128xi1> to vector<4x128xi32>
    %351 = arith.sitofp %350 : vector<4x128xi32> to vector<4x128xf32>
    %352 = arith.truncf %351 : vector<4x128xf32> to vector<4x128xbf16>
    %cst_62 = arith.constant dense<0.000000e+00> : vector<4x96xf32>
    %353 = tpu.matmul %352, %1, %cst_62 {dimension_numbers = #tpu.dot_dimension_numbers<[1], [0], [0], [1], [0, 0, 1, 1], [], []>} : vector<4x128xbf16>, vector<128x96xbf16>, vector<4x96xf32> -> vector<4x96xf32>
    %354 = vector.extract_strided_slice %329 {offsets = [0, 128], sizes = [4, 96], strides = [1, 1]} : vector<4x224xf32> to vector<4x96xf32>
    %355 = vector.extract_strided_slice %353 {offsets = [0, 0], sizes = [4, 64], strides = [1, 1]} : vector<4x96xf32> to vector<4x64xf32>
    %356 = vector.extract_strided_slice %354 {offsets = [0, 0], sizes = [4, 64], strides = [1, 1]} : vector<4x96xf32> to vector<4x64xf32>
    %357 = arith.addf %355, %356 : vector<4x64xf32>
    %358 = arith.negf %357 : vector<4x64xf32>
    %359 = math.exp %358 : vector<4x64xf32>
    %cst_63 = arith.constant 1.000000e+00 : f32
    %360 = vector.broadcast %cst_63 : f32 to vector<4x64xf32>
    %361 = arith.addf %360, %359 : vector<4x64xf32>
    %362 = arith.divf %360, %361 : vector<4x64xf32>
    %363 = vector.extract_strided_slice %362 {offsets = [0, 0], sizes = [4, 32], strides = [1, 1]} : vector<4x64xf32> to vector<4x32xf32>
    %364 = vector.extract_strided_slice %362 {offsets = [0, 32], sizes = [4, 32], strides = [1, 1]} : vector<4x64xf32> to vector<4x32xf32>
    %365 = vector.extract_strided_slice %353 {offsets = [0, 64], sizes = [4, 32], strides = [1, 1]} : vector<4x96xf32> to vector<4x32xf32>
    %366 = vector.extract_strided_slice %354 {offsets = [0, 64], sizes = [4, 32], strides = [1, 1]} : vector<4x96xf32> to vector<4x32xf32>
    %367 = arith.mulf %363, %366 : vector<4x32xf32>
    %368 = arith.addf %365, %367 : vector<4x32xf32>
    %369 = math.tanh %368 : vector<4x32xf32>
    %cst_64 = arith.constant 1.000000e+00 : f32
    %370 = vector.broadcast %cst_64 : f32 to vector<4x32xf32>
    %371 = arith.subf %370, %364 : vector<4x32xf32>
    %372 = arith.mulf %371, %369 : vector<4x32xf32>
    %373 = arith.mulf %364, %326 : vector<4x32xf32>
    %374 = arith.addf %372, %373 : vector<4x32xf32>
    %375 = arith.truncf %374 : vector<4x32xf32> to vector<4x32xbf16>
    %cst_65 = arith.constant dense<0.000000e+00> : vector<4x128xf32>
    %376 = tpu.matmul %375, %7, %cst_65 {dimension_numbers = #tpu.dot_dimension_numbers<[1], [0], [0], [1], [0, 0, 1, 1], [], []>} : vector<4x32xbf16>, vector<32x128xbf16>, vector<4x128xf32> -> vector<4x128xf32>
    %377 = arith.addf %376, %8 : vector<4x128xf32>
    %cst_66 = arith.constant dense<0xFF800000> : vector<4xf32>
    %378 = vector.multi_reduction <maximumf>, %377, %cst_66 [1] : vector<4x128xf32> to vector<4xf32>
    %379 = vector.shape_cast %378 : vector<4xf32> to vector<4x1xf32>
    %380 = vector.broadcast %379 : vector<4x1xf32> to vector<4x128xf32>
    %381 = arith.subf %377, %380 : vector<4x128xf32>
    %382 = math.exp %381 : vector<4x128xf32>
    %cst_67 = arith.constant dense<0.000000e+00> : vector<4xf32>
    %383 = vector.multi_reduction <add>, %382, %cst_67 [1] : vector<4x128xf32> to vector<4xf32>
    %384 = vector.shape_cast %383 : vector<4xf32> to vector<4x1xf32>
    %385 = math.log %384 : vector<4x1xf32>
    %386 = arith.addf %385, %379 : vector<4x1xf32>
    %387 = vector.broadcast %386 : vector<4x1xf32> to vector<4x128xf32>
    %388 = arith.subf %377, %387 : vector<4x128xf32>
    %389 = tpu.concatenate %59, %107, %155, %203, %251, %299, %347, %388 in 0 : vector<4x128xf32>, vector<4x128xf32>, vector<4x128xf32>, vector<4x128xf32>, vector<4x128xf32>, vector<4x128xf32>, vector<4x128xf32>, vector<4x128xf32> -> vector<32x128xf32>
    %c0_68 = arith.constant 0 : index
    %c0_69 = arith.constant 0 : index
    %390 = vector.load %arg4[%c0_68, %c0_69] : memref<32x128xf32, #tpu.memory_space<vmem>>, vector<32x128xf32>
    tpu.vector_store %arg4[%c0_68, %c0_69], %389 {strides = array<i32>} : memref<32x128xf32, #tpu.memory_space<vmem>>, vector<32x128xf32>,
    %c0_70 = arith.constant 0 : index
    %c0_71 = arith.constant 0 : index
    %391 = vector.load %arg5[%c0_70, %c0_71] : memref<4x32xf32, #tpu.memory_space<vmem>>, vector<4x32xf32>
    tpu.vector_store %arg5[%c0_70, %c0_71], %374 {strides = array<i32>} : memref<4x32xf32, #tpu.memory_space<vmem>>, vector<4x32xf32>,
    return
  }
}

</mosaic_0001>

<bundles_post_ra>
// kernel: decoder_rnn_forward.1
= control target key start
LH: loop header
LB: loop body
LE: loop exit
PB: predicated region body
PF: predicated region fallthrough
CT: control target
= control target key end

     0   :  { %s1794_s0 = inlined_call_operand.vmem [shape: f32[4,32], index: 0, kind: input, shape index: {}]   ;;  %s1795_s1 = inlined_call_operand.vmem [shape: bf16[128,96], index: 1, kind: input, shape index: {}]   ;;  %s1796_s2 = inlined_call_operand.vmem [shape: bf16[32,224], index: 2, kind: input, shape index: {}]   ;;  %s1797_s3 = inlined_call_operand.vmem [shape: f32[1,224], index: 3, kind: input, shape index: {}]   ;;  %s1798_s4 = inlined_call_operand.vmem [shape: f32[32,128], index: 4, kind: output, shape index: {0}]   ;;  %s1799_s5 = inlined_call_operand.hbm [shape: f32[4,32], index: 5, kind: output, shape index: {1}]  }
   0x1   :  { %v1366_v0 = vld [vmem:[%s1795_s1 + $0x38] sm:$0xff]  ;;  %v1372_v1 = vld [vmem:[%s1795_s1 + $0x30] sm:$0xff] }
   0x2   :  { %102 = vmatpush.bf16.msra.mxu0 %v1366_v0  ;;  %v1215_v2 = vld [vmem:[%s1796_s2 + $0x14] sm:$0xf]  ;;  %264 = vmatpush.bf16.msra.mxu1 %v1366_v0  ;;  %v1148_v3 = vld [vmem:[%s1796_s2 + $0x18] sm:$0xf0] }
   0x3   :  { %v1381_v4 = vor.u32 %v1215_v2, %v1148_v3 }
   0x4   :  { %11 = vsyncpa [#allocation3], 0  ;;  %v1213_v5 = vld [vmem:[%s1796_s2 + $0x4] sm:$0xf]  ;;  %v1144_v6 = vld [vmem:[%s1796_s2 + $0x8] sm:$0xf0]  ;;  %v48_v12 = vlaneseq }
   0x5   :  { %v1393_v7 = vld [vmem:[%s1795_s1 + $0x28] sm:$0xff]  ;;  %222 = vmatpush.bf16.msra.mxu3 %v1381_v4  ;;  %v1397_v8 = vor.u32 %v1213_v5, %v1144_v6  ;;  %v1403_v9 = vld [vmem:[%s1795_s1 + $0x20] sm:$0xff]  ;;  %v1412_v10 = vld [vmem:[%s1795_s1 + $0x18] sm:$0xff]  ;;  %v1328_v16 = vmov 1.0|1.0   ;;  %vm128_vm2 = vcmask 261120  }
   0x6   :  { %103 = vmatpush.bf16.msra.mxu0 %v1372_v1  ;;  %265 = vmatpush.bf16.msra.mxu1 %v1372_v1  ;;  %v1420_v11 = vld [vmem:[%s1795_s1 + $0x10] sm:$0xff]  ;;  %v1427_v13 = vld [vmem:[%s1795_s1 + $0x8] sm:$0xff]  ;;  %v1429_v14 = vand.u32 127, %v48_v12  ;;  %v1436_v15 = vld [vmem:[%s1795_s1] sm:$0xff]  ;;  %s1329_s19 = smov 64   ;;  %s1331_s20 = smov 32  }
   0x7   :  { %v21_v17 = vld [vmem:[%s1794_s0] sm:$0xf]  ;;  %v1160_v45 = vld [vmem:[%s1796_s2 + $0x10] sm:$0xf]  ;;  %v1216_v46 = vld [vmem:[%s1796_s2 + $0x14] sm:$0xf0] }
   0x8   :  { %vm50_vm0 = vcmp.eq.s32.totalorder %v1429_v14, 0  ;;  %v115_v18 = vpack.c.bf16 %v21_v17, %v21_v17  ;;  %v1464_v21 = vld [vmem:[%s1797_s3] sm:$0x3]  ;;  %s1330_s3 = smov 96   ;;  %v1482_v48 = vor.u32 %v1216_v46, %v1160_v45  ;;  %v1214_v49 = vld [vmem:[%s1796_s2 + $0x4] sm:$0xf0] }
   0x9   :  { %223 = vmatpush.bf16.msra.mxu3 %v1397_v8  ;;  %vm1142_vm1 = vmpackc.low %vm50_vm0, %vm50_vm0  ;;  %v1467_v22 = vperm.slane %v1464_v21, 1  ;;  %v1156_v47 = vld [vmem:[%s1796_s2] sm:$0xf]  ;;  %v1511_v59 = vperm.slane %v1464_v21, 0  ;;  %vm229_vm7 = vcmask 1043456   ;;  %s1332_s7 = smov [#allocation2]  }
   0xa   :  { %104 = vmatpush.bf16.msra.mxu0 %v1393_v7  ;;  %266 = vmatpush.bf16.msra.mxu1 %v1393_v7  ;;  %v1488_v50 = vor.u32 %v1214_v49, %v1156_v47  ;;  %s1096_s8 = sshll.u32 %s1332_s7, 4  ;;  %s1098_s11 = sshll.u32 %s1799_s5, 4  ;;  %s1097_s8 = int_to_ptr.vmem [resolvable:$true] %s1096_s8  ;;  %s1099_s11 = int_to_ptr.hbm [resolvable:$true] %s1098_s11 }
   0xb   :  { %209 = vmatpush.bf16.msra.mxu2 %v1482_v48 }
   0xd   :  { %342 = vmatpush.bf16.msrb.mxu3 %v1381_v4 }
   0xe   :  { %105 = vmatpush.bf16.msra.mxu0 %v1403_v9  ;;  %267 = vmatpush.bf16.msra.mxu1 %v1403_v9 }
   0xf   :  { %210 = vmatpush.bf16.msra.mxu2 %v1488_v50 }
  0x11   :  { %343 = vmatpush.bf16.msrb.mxu3 %v1397_v8 }
  0x12   :  { %106 = vmatpush.bf16.msra.mxu0 %v1412_v10  ;;  %268 = vmatpush.bf16.msra.mxu1 %v1412_v10 }
  0x13   :  { %329 = vmatpush.bf16.msrb.mxu2 %v1482_v48 }
  0x16   :  { %107 = vmatpush.bf16.msra.mxu0 %v1420_v11  ;;  %269 = vmatpush.bf16.msra.mxu1 %v1420_v11 }
  0x17   :  { %330 = vmatpush.bf16.msrb.mxu2 %v1488_v50 }
  0x1a   :  { %108 = vmatpush.bf16.msra.mxu0 %v1427_v13  ;;  %270 = vmatpush.bf16.msra.mxu1 %v1427_v13 }
  0x1e   :  { %109 = vmatpush.bf16.msra.mxu0 %v1436_v15  ;;  %271 = vmatpush.bf16.msra.mxu1 %v1436_v15 }
  0x21   :  { %1143 = vmatmul.msk.bf16.vlgmr.msra.gmra.mxu0 %vm1142_vm1, %v1328_v16 }
  0x22   :  { %138 = vmatpush.bf16.msrb.mxu0 %v1381_v4  ;;  %502 = vmatpush.bf16.msrb.mxu1 %v1366_v0 }
  0x26   :  { %139 = vmatpush.bf16.msrb.mxu0 %v1397_v8  ;;  %503 = vmatpush.bf16.msrb.mxu1 %v1372_v1 }
  0x2a   :  { %461 = vmatpush.bf16.msra.mxu0 %v1381_v4  ;;  %504 = vmatpush.bf16.msrb.mxu1 %v1393_v7 }
  0x2e   :  { %462 = vmatpush.bf16.msra.mxu0 %v1397_v8  ;;  %505 = vmatpush.bf16.msrb.mxu1 %v1403_v9 }
  0x31   :  { %1152 = vmatmul.msk.bf16.vlgmr.msrb.gmra.mxu0 %vm128_vm2, %v115_v18 }
  0x32   :  { %506 = vmatpush.bf16.msrb.mxu1 %v1412_v10  ;;  %580 = vmatpush.bf16.msrb.mxu0 %v1381_v4 }
  0x36   :  { %507 = vmatpush.bf16.msrb.mxu1 %v1420_v11  ;;  %581 = vmatpush.bf16.msrb.mxu0 %v1397_v8 }
  0x3a   :  { %508 = vmatpush.bf16.msrb.mxu1 %v1427_v13 }
  0x3e   :  { %509 = vmatpush.bf16.msrb.mxu1 %v1436_v15 }
  0x9e   :  { %v111_v19 = vpop.f32.mrf.mxu0 }
  0xa6   :  { %v113_v20 = vpop.f32.mrf.mxu0 }
  0xae   :  { %v141_v23 = vpop.f32.mrf.mxu0 }
  0xaf   :  { %v142_v24 = vadd.f32 %v141_v23, %v1467_v22 }
  0xb1   :  { %166 = vrot.lane.b32.xlu0 %v142_v24, %s1329_s19  ;;  %v145_v26 = vadd.f32 %v142_v24, %v111_v19 }
  0xb3   :  { %v1153_v27 = vmul.f32 -1.442695, %v145_v26 }
  0xb5   :  { %1222 = vpow2.f32 %v1153_v27 }
  0xb6   :  { %v143_v25 = vpop.f32.mrf.mxu0 }
  0xbb   :  { %v1223_v28 = vpop.eup %1222 }
  0xbc   :  { %v149_v29 = vadd.f32 1.0, %v1223_v28 }
  0xbe   :  { %1224 = vrcp.f32 %v149_v29  ;;  %v161_v35 = vand.u32 2147483648, %v149_v29  ;;  %vm155_vm4 = vweird.f32 %v149_v29  ;;  %v159_v36 = vand.u32 2147483647, %v149_v29 }
  0xc0   :  { %v162_v38 = vor.u32 1.1754944e-38, %v161_v35  ;;  %vm160_vm6 = vcmp.eq.f32.partialorder %v159_v36, 8.507059e+37 }
  0xc4   :  { %v1225_v30 = vpop.eup %1224 }
  0xc5   :  { %v151_v31 = vmul.f32 %v1225_v30, %v149_v29  ;;  %vm156_vm3 = vweird.f32 %v1225_v30 }
  0xc6   :  { %vm157_vm5 = vmor %vm155_vm4, %vm156_vm3 }
  0xc7   :  { %v152_v32 = vsub.f32 1.0, %v151_v31 }
  0xc9   :  { %v153_v33 = vmul.f32 %v1225_v30, %v152_v32 }
  0xcb   :  { %v154_v34 = vadd.f32 %v1225_v30, %v153_v33 }
  0xcd   :  { %v158_v37 = vsel %vm157_vm5, %v1225_v30, %v154_v34 }
  0xce   :  { %v163_v40 = vsel %vm160_vm6, %v162_v38, %v158_v37 }
  0xcf   :  { %v176_v52 = vsub.f32 1.0, %v163_v40 }
 0x123   :  { %v167_v39 = vpop.permute.xlu0 %166 }
 0x124   :  { %v169_v41 = vmul.f32 %v167_v39, %v163_v40 }
 0x126   :  { %171 = vrot.lane.b32.xlu0 %v169_v41, %s1329_s19 }
 0x198   :  { %v172_v42 = vpop.permute.xlu0 %171 }
 0x199   :  { %v174_v43 = vadd.f32 %v172_v42, %v111_v19 }
 0x19b   :  { %1226 = vtanh.f32 %v174_v43 }
 0x1a1   :  { %v1227_v44 = vpop.eup %1226 }
 0x1a2   :  { %178 = vrot.lane.b32.xlu1 %v1227_v44, %s1330_s3 }
 0x1aa   :  { %183 = vrot.lane.b32.xlu1 %v21_v17, %s1331_s20 }
 0x214   :  { %v179_v51 = vpop.permute.xlu1 %178 }
 0x215   :  { %v181_v54 = vmul.f32 %v179_v51, %v176_v52 }
 0x21c   :  { %v184_v53 = vpop.permute.xlu1 %183 }
 0x21d   :  { %v186_v55 = vmul.f32 %v184_v53, %v163_v40 }
 0x21f   :  { %v1493_v56 = vadd.f32 %v186_v55, %v181_v54 }
 0x221   :  { %v188_v57 = vpack.c.bf16 %v1493_v56, %v1493_v56 }
 0x223   :  { %190 = vrot.lane.b32.xlu2 %v188_v57, %s1330_s3 }
 0x27d   :  { %v191_v58 = vpop.permute.xlu2 %190 }
 0x27e   :  { %1162 = vmatmul.msk.bf16.vlgmr.msra.gmra.mxu2 %vm128_vm2, %v191_v58  ;;  %1163 = vmatmul.msk.bf16.vlgmr.msra.gmra.mxu3 %vm128_vm2, %v191_v58 }
 0x27f   :  { %383 = vmatpush.bf16.msra.mxu2 %v1366_v0  ;;  %448 = vmatpush.bf16.msra.mxu3 %v1482_v48 }
 0x283   :  { %384 = vmatpush.bf16.msra.mxu2 %v1372_v1  ;;  %449 = vmatpush.bf16.msra.mxu3 %v1488_v50 }
 0x287   :  { %385 = vmatpush.bf16.msra.mxu2 %v1393_v7 }
 0x28b   :  { %386 = vmatpush.bf16.msra.mxu2 %v1403_v9 }
 0x28f   :  { %387 = vmatpush.bf16.msra.mxu2 %v1412_v10 }
 0x293   :  { %388 = vmatpush.bf16.msra.mxu2 %v1420_v11 }
 0x297   :  { %389 = vmatpush.bf16.msra.mxu2 %v1427_v13 }
 0x29b   :  { %390 = vmatpush.bf16.msra.mxu2 %v1436_v15 }
 0x301   :  { %v212_v60 = vpop.f32.mrf.mxu2  ;;  %v225_v61 = vpop.f32.mrf.mxu3 }
 0x302   :  { %v1514_v62 = vadd.f32 %v212_v60, %v1511_v59  ;;  %v226_v5 = vadd.f32 %v225_v61, %v1467_v22 }
 0x304   :  { %v230_v63 = vsel %vm229_vm7, %v1514_v62, -inf }
 0x305   :  { %231 = vmax.xlane.f32.xlu2 %v230_v63 }
 0x309   :  { %v214_v2 = vpop.f32.mrf.mxu2  ;;  %v227_v3 = vpop.f32.mrf.mxu3 }
 0x31d   :  { %298 = vrot.lane.b32.xlu2 %v226_v5, %s1329_s19 }
 0x378   :  { %v1520_v6 = vpop.xlane.xlu2 %231 }
 0x379   :  { %vm233_vm8 = vcmp.ge.f32.partialorder %v1514_v62, %v1520_v6 }
 0x37a   :  { %v234_v12 = vsel %vm233_vm8, %v1429_v14, 128 }
 0x37b   :  { %v235_v17 = vsel %vm229_vm7, %v234_v12, 2147483647 }
 0x37c   :  { %v237_v18 = vshra.s32 %v235_v17, 16  ;;  %v236_v20 = vand.u32 65535, %v235_v17 }
 0x37e   :  { %v239_v19 = vcvt.s32.f32 %v237_v18  ;;  %v238_v23 = vcvt.s32.f32 %v236_v20 }
 0x380   :  { %240 = vmin.xlane.f32.xlu0 %v239_v19  ;;  %v299_v45 = vpop.permute.xlu2 %298 }
 0x3f3   :  { %v241_v21 = vpop.xlane.xlu0 %240 }
 0x3f4   :  { %vm242_vm9 = vcmp.eq.f32.partialorder %v239_v19, %v241_v21  ;;  %v247_v25 = vcvt.f32.s32 %v241_v21 }
 0x3f5   :  { %v243_v24 = vsel %vm242_vm9, %v238_v23, inf }
 0x3f6   :  { %244 = vmin.xlane.f32.xlu1 %v243_v24  ;;  %v248_v27 = vshll.u32 %v247_v25, 16 }
 0x469   :  { %v245_v26 = vpop.xlane.xlu1 %244 }
 0x46a   :  { %v246_v28 = vcvt.f32.s32 %v245_v26 }
 0x46c   :  { %v249_v29 = vadd.s32 %v248_v27, %v246_v28 }
 0x46e   :  { %vm260_vm10 = vcmp.eq.s32.totalorder %v1429_v14, %v249_v29 }
 0x46f   :  { %vm1165_vm11 = vmpackc.low %vm260_vm10, %vm260_vm10 }
 0x470   :  { %1166 = vmatmul.msk.bf16.vlgmr.msra.gmra.mxu1 %vm1165_vm11, %v1328_v16 }
 0x471   :  { %740 = vmatpush.bf16.msra.mxu1 %v1366_v0 }
 0x475   :  { %741 = vmatpush.bf16.msra.mxu1 %v1372_v1 }
 0x479   :  { %742 = vmatpush.bf16.msra.mxu1 %v1393_v7 }
 0x47d   :  { %743 = vmatpush.bf16.msra.mxu1 %v1403_v9 }
 0x481   :  { %744 = vmatpush.bf16.msra.mxu1 %v1412_v10 }
 0x485   :  { %745 = vmatpush.bf16.msra.mxu1 %v1420_v11 }
 0x489   :  { %746 = vmatpush.bf16.msra.mxu1 %v1427_v13 }
 0x48d   :  { %747 = vmatpush.bf16.msra.mxu1 %v1436_v15 }
 0x4ed   :  { %v273_v30 = vpop.f32.mrf.mxu1 }
 0x4ee   :  { %v277_v31 = vadd.f32 %v273_v30, %v226_v5 }
 0x4f0   :  { %v1167_v32 = vmul.f32 -1.442695, %v277_v31 }
 0x4f2   :  { %1228 = vpow2.f32 %v1167_v32 }
 0x4f5   :  { %v275_v33 = vpop.f32.mrf.mxu1 }
 0x4f8   :  { %v1229_v34 = vpop.eup %1228 }
 0x4f9   :  { %v281_v35 = vadd.f32 1.0, %v1229_v34 }
 0x4fb   :  { %1230 = vrcp.f32 %v281_v35  ;;  %v293_v39 = vand.u32 2147483648, %v281_v35  ;;  %v291_v41 = vand.u32 2147483647, %v281_v35  ;;  %vm287_vm13 = vweird.f32 %v281_v35 }
 0x4fd   :  { %v294_v43 = vor.u32 1.1754944e-38, %v293_v39  ;;  %vm292_vm15 = vcmp.eq.f32.partialorder %v291_v41, 8.507059e+37 }
 0x501   :  { %v1231_v36 = vpop.eup %1230 }
 0x502   :  { %v283_v37 = vmul.f32 %v1231_v36, %v281_v35  ;;  %vm288_vm12 = vweird.f32 %v1231_v36 }
 0x503   :  { %vm289_vm14 = vmor %vm287_vm13, %vm288_vm12 }
 0x504   :  { %v284_v38 = vsub.f32 1.0, %v283_v37 }
 0x506   :  { %v285_v40 = vmul.f32 %v1231_v36, %v284_v38 }
 0x508   :  { %v286_v42 = vadd.f32 %v1231_v36, %v285_v40 }
 0x50a   :  { %v290_v44 = vsel %vm289_vm14, %v1231_v36, %v286_v42 }
 0x50b   :  { %v295_v46 = vsel %vm292_vm15, %v294_v43, %v290_v44 }
 0x50c   :  { %v301_v47 = vmul.f32 %v299_v45, %v295_v46  ;;  %v308_v53 = vsub.f32 1.0, %v295_v46  ;;  %v314_v55 = vmul.f32 %v295_v46, %v1493_v56 }
 0x50e   :  { %303 = vrot.lane.b32.xlu0 %v301_v47, %s1329_s19 }
 0x580   :  { %v304_v49 = vpop.permute.xlu0 %303 }
 0x581   :  { %v306_v51 = vadd.f32 %v304_v49, %v273_v30 }
 0x583   :  { %1232 = vtanh.f32 %v306_v51 }
 0x589   :  { %v1233_v52 = vpop.eup %1232 }
 0x58a   :  { %310 = vrot.lane.b32.xlu1 %v1233_v52, %s1330_s3 }
 0x5fc   :  { %v311_v54 = vpop.permute.xlu1 %310 }
 0x5fd   :  { %v313_v57 = vmul.f32 %v311_v54, %v308_v53 }
 0x5ff   :  { %v1539_v58 = vadd.f32 %v314_v55, %v313_v57 }
 0x601   :  { %v316_v60 = vpack.c.bf16 %v1539_v58, %v1539_v58 }
 0x603   :  { %318 = vrot.lane.b32.xlu2 %v316_v60, %s1330_s3 }
 0x65d   :  { %v319_v61 = vpop.permute.xlu2 %318 }
 0x65e   :  { %1168 = vmatmul.msk.bf16.vlgmr.msrb.gmra.mxu2 %vm128_vm2, %v319_v61  ;;  %1169 = vmatmul.msk.bf16.vlgmr.msrb.gmra.mxu3 %vm128_vm2, %v319_v61 }
 0x65f   :  { %567 = vmatpush.bf16.msrb.mxu3 %v1482_v48  ;;  %621 = vmatpush.bf16.msrb.mxu2 %v1366_v0 }
 0x663   :  { %568 = vmatpush.bf16.msrb.mxu3 %v1488_v50  ;;  %622 = vmatpush.bf16.msrb.mxu2 %v1372_v1 }
 0x667   :  { %623 = vmatpush.bf16.msrb.mxu2 %v1393_v7 }
 0x66b   :  { %624 = vmatpush.bf16.msrb.mxu2 %v1403_v9 }
 0x66f   :  { %625 = vmatpush.bf16.msrb.mxu2 %v1412_v10 }
 0x673   :  { %626 = vmatpush.bf16.msrb.mxu2 %v1420_v11 }
 0x677   :  { %627 = vmatpush.bf16.msrb.mxu2 %v1427_v13 }
 0x67b   :  { %628 = vmatpush.bf16.msrb.mxu2 %v1436_v15 }
 0x6e1   :  { %v332_v56 = vpop.f32.mrf.mxu2  ;;  %v345_v63 = vpop.f32.mrf.mxu3 }
 0x6e2   :  { %v1557_v2 = vadd.f32 %v332_v56, %v1511_v59  ;;  %v346_v17 = vadd.f32 %v345_v63, %v1467_v22 }
 0x6e4   :  { %v349_v3 = vsel %vm229_vm7, %v1557_v2, -inf }
 0x6e5   :  { %350 = vmax.xlane.f32.xlu0 %v349_v3 }
 0x6e9   :  { %v334_v5 = vpop.f32.mrf.mxu2  ;;  %v347_v12 = vpop.f32.mrf.mxu3 }
 0x6f9   :  { %417 = vrot.lane.b32.xlu0 %v346_v17, %s1329_s19 }
 0x758   :  { %v1563_v18 = vpop.xlane.xlu0 %350 }
 0x759   :  { %vm352_vm0 = vcmp.ge.f32.partialorder %v1557_v2, %v1563_v18 }
 0x75a   :  { %v353_v19 = vsel %vm352_vm0, %v1429_v14, 128 }
 0x75b   :  { %v354_v20 = vsel %vm229_vm7, %v353_v19, 2147483647 }
 0x75c   :  { %v356_v21 = vshra.s32 %v354_v20, 16  ;;  %v355_v24 = vand.u32 65535, %v354_v20 }
 0x75e   :  { %v358_v23 = vcvt.s32.f32 %v356_v21  ;;  %v357_v26 = vcvt.s32.f32 %v355_v24 }
 0x760   :  { %359 = vmin.xlane.f32.xlu2 %v358_v23 }
 0x76b   :  { %v418_v49 = vpop.permute.xlu0 %417 }
 0x7d3   :  { %v360_v25 = vpop.xlane.xlu2 %359 }
 0x7d4   :  { %vm361_vm1 = vcmp.eq.f32.partialorder %v358_v23, %v360_v25  ;;  %v366_v28 = vcvt.f32.s32 %v360_v25 }
 0x7d5   :  { %v362_v27 = vsel %vm361_vm1, %v357_v26, inf }
 0x7d6   :  { %363 = vmin.xlane.f32.xlu1 %v362_v27  ;;  %v367_v30 = vshll.u32 %v366_v28, 16 }
 0x849   :  { %v364_v29 = vpop.xlane.xlu1 %363 }
 0x84a   :  { %v365_v31 = vcvt.f32.s32 %v364_v29 }
 0x84c   :  { %v368_v32 = vadd.s32 %v367_v30, %v365_v31 }
 0x84e   :  { %vm379_vm3 = vcmp.eq.s32.totalorder %v1429_v14, %v368_v32 }
 0x84f   :  { %vm1171_vm4 = vmpackc.low %vm379_vm3, %vm379_vm3 }
 0x850   :  { %1172 = vmatmul.msk.bf16.vlgmr.msra.gmra.mxu2 %vm1171_vm4, %v1328_v16 }
 0x851   :  { %859 = vmatpush.bf16.msra.mxu2 %v1366_v0 }
 0x855   :  { %860 = vmatpush.bf16.msra.mxu2 %v1372_v1 }
 0x859   :  { %861 = vmatpush.bf16.msra.mxu2 %v1393_v7 }
 0x85d   :  { %862 = vmatpush.bf16.msra.mxu2 %v1403_v9 }
 0x861   :  { %863 = vmatpush.bf16.msra.mxu2 %v1412_v10 }
 0x865   :  { %864 = vmatpush.bf16.msra.mxu2 %v1420_v11 }
 0x869   :  { %865 = vmatpush.bf16.msra.mxu2 %v1427_v13 }
 0x86d   :  { %866 = vmatpush.bf16.msra.mxu2 %v1436_v15 }
 0x8d3   :  { %v392_v33 = vpop.f32.mrf.mxu2 }
 0x8d4   :  { %v396_v34 = vadd.f32 %v392_v33, %v346_v17 }
 0x8d6   :  { %v1173_v35 = vmul.f32 -1.442695, %v396_v34 }
 0x8d8   :  { %1234 = vpow2.f32 %v1173_v35 }
 0x8db   :  { %v394_v36 = vpop.f32.mrf.mxu2 }
 0x8de   :  { %v1235_v37 = vpop.eup %1234 }
 0x8df   :  { %v400_v38 = vadd.f32 1.0, %v1235_v37 }
 0x8e1   :  { %1236 = vrcp.f32 %v400_v38  ;;  %v412_v42 = vand.u32 2147483648, %v400_v38  ;;  %v410_v44 = vand.u32 2147483647, %v400_v38  ;;  %vm406_vm6 = vweird.f32 %v400_v38 }
 0x8e3   :  { %v413_v46 = vor.u32 1.1754944e-38, %v412_v42  ;;  %vm411_vm9 = vcmp.eq.f32.partialorder %v410_v44, 8.507059e+37 }
 0x8e7   :  { %v1237_v39 = vpop.eup %1236 }
 0x8e8   :  { %v402_v40 = vmul.f32 %v1237_v39, %v400_v38  ;;  %vm407_vm5 = vweird.f32 %v1237_v39 }
 0x8e9   :  { %vm408_vm8 = vmor %vm406_vm6, %vm407_vm5 }
 0x8ea   :  { %v403_v41 = vsub.f32 1.0, %v402_v40 }
 0x8ec   :  { %v404_v43 = vmul.f32 %v1237_v39, %v403_v41 }
 0x8ee   :  { %v405_v45 = vadd.f32 %v1237_v39, %v404_v43 }
 0x8f0   :  { %v409_v47 = vsel %vm408_vm8, %v1237_v39, %v405_v45 }
 0x8f1   :  { %v414_v51 = vsel %vm411_vm9, %v413_v46, %v409_v47 }
 0x8f2   :  { %v420_v52 = vmul.f32 %v418_v49, %v414_v51  ;;  %v427_v57 = vsub.f32 1.0, %v414_v51  ;;  %v433_v61 = vmul.f32 %v414_v51, %v1539_v58 }
 0x8f4   :  { %422 = vrot.lane.b32.xlu2 %v420_v52, %s1329_s19 }
 0x94e   :  { %v423_v53 = vpop.permute.xlu2 %422 }
 0x94f   :  { %v425_v54 = vadd.f32 %v423_v53, %v392_v33 }
 0x951   :  { %1238 = vtanh.f32 %v425_v54 }
 0x957   :  { %v1239_v55 = vpop.eup %1238 }
 0x958   :  { %429 = vrot.lane.b32.xlu1 %v1239_v55, %s1330_s3 }
 0x9ca   :  { %v430_v60 = vpop.permute.xlu1 %429 }
 0x9cb   :  { %v432_v56 = vmul.f32 %v430_v60, %v427_v57 }
 0x9cd   :  { %v1582_v63 = vadd.f32 %v433_v61, %v432_v56 }
 0x9cf   :  { %v435_v3 = vpack.c.bf16 %v1582_v63, %v1582_v63 }
 0x9d1   :  { %437 = vrot.lane.b32.xlu0 %v435_v3, %s1330_s3 }
 0xa43   :  { %v438_v5 = vpop.permute.xlu0 %437 }
 0xa44   :  { %1174 = vmatmul.msk.bf16.vlgmr.msra.gmra.mxu3 %vm128_vm2, %v438_v5  ;;  %1175 = vmatmul.msk.bf16.vlgmr.msra.gmra.mxu0 %vm128_vm2, %v438_v5 }
 0xa45   :  { %686 = vmatpush.bf16.msra.mxu3 %v1482_v48  ;;  %699 = vmatpush.bf16.msra.mxu0 %v1381_v4 }
 0xa49   :  { %687 = vmatpush.bf16.msra.mxu3 %v1488_v50  ;;  %700 = vmatpush.bf16.msra.mxu0 %v1397_v8 }
 0xac1   :  { %v464_v58 = vpop.f32.mrf.mxu0 }
 0xac2   :  { %v465_v23 = vadd.f32 %v464_v58, %v1467_v22 }
 0xac7   :  { %v451_v12 = vpop.f32.mrf.mxu3 }
 0xac8   :  { %v1594_v17 = vadd.f32 %v451_v12, %v1511_v59 }
 0xac9   :  { %v466_v19 = vpop.f32.mrf.mxu0 }
 0xaca   :  { %v468_v20 = vsel %vm229_vm7, %v1594_v17, -inf }
 0xacb   :  { %469 = vmax.xlane.f32.xlu2 %v468_v20 }
 0xacf   :  { %v453_v21 = vpop.f32.mrf.mxu3 }
 0xae3   :  { %536 = vrot.lane.b32.xlu2 %v465_v23, %s1329_s19 }
 0xb3e   :  { %v1600_v24 = vpop.xlane.xlu2 %469 }
 0xb3f   :  { %vm471_vm10 = vcmp.ge.f32.partialorder %v1594_v17, %v1600_v24 }
 0xb40   :  { %v472_v25 = vsel %vm471_vm10, %v1429_v14, 128 }
 0xb41   :  { %v473_v26 = vsel %vm229_vm7, %v472_v25, 2147483647 }
 0xb42   :  { %v475_v27 = vshra.s32 %v473_v26, 16  ;;  %v474_v29 = vand.u32 65535, %v473_v26 }
 0xb44   :  { %v477_v28 = vcvt.s32.f32 %v475_v27  ;;  %v476_v31 = vcvt.s32.f32 %v474_v29 }
 0xb46   :  { %478 = vmin.xlane.f32.xlu0 %v477_v28  ;;  %v537_v45 = vpop.permute.xlu2 %536 }
 0xbb9   :  { %v479_v30 = vpop.xlane.xlu0 %478 }
 0xbba   :  { %vm480_vm11 = vcmp.eq.f32.partialorder %v477_v28, %v479_v30  ;;  %v485_v33 = vcvt.f32.s32 %v479_v30 }
 0xbbb   :  { %v481_v32 = vsel %vm480_vm11, %v476_v31, inf }
 0xbbc   :  { %482 = vmin.xlane.f32.xlu1 %v481_v32  ;;  %v486_v35 = vshll.u32 %v485_v33, 16 }
 0xc2f   :  { %v483_v34 = vpop.xlane.xlu1 %482 }
 0xc30   :  { %v484_v36 = vcvt.f32.s32 %v483_v34 }
 0xc32   :  { %v487_v37 = vadd.s32 %v486_v35, %v484_v36 }
 0xc34   :  { %vm498_vm12 = vcmp.eq.s32.totalorder %v1429_v14, %v487_v37 }
 0xc35   :  { %vm1177_vm13 = vmpackc.low %vm498_vm12, %vm498_vm12 }
 0xc36   :  { %1178 = vmatmul.msk.bf16.vlgmr.msrb.gmra.mxu1 %vm1177_vm13, %v1328_v16 }
 0xc37   :  { %978 = vmatpush.bf16.msrb.mxu1 %v1366_v0 }
 0xc3b   :  { %979 = vmatpush.bf16.msrb.mxu1 %v1372_v1 }
 0xc3f   :  { %980 = vmatpush.bf16.msrb.mxu1 %v1393_v7 }
 0xc43   :  { %981 = vmatpush.bf16.msrb.mxu1 %v1403_v9 }
 0xc47   :  { %982 = vmatpush.bf16.msrb.mxu1 %v1412_v10 }
 0xc4b   :  { %983 = vmatpush.bf16.msrb.mxu1 %v1420_v11 }
 0xc4f   :  { %984 = vmatpush.bf16.msrb.mxu1 %v1427_v13 }
 0xc53   :  { %985 = vmatpush.bf16.msrb.mxu1 %v1436_v15 }
 0xcb3   :  { %v511_v38 = vpop.f32.mrf.mxu1 }
 0xcb4   :  { %v515_v39 = vadd.f32 %v511_v38, %v465_v23 }
 0xcb6   :  { %v1179_v40 = vmul.f32 -1.442695, %v515_v39 }
 0xcb8   :  { %1240 = vpow2.f32 %v1179_v40 }
 0xcbb   :  { %v513_v41 = vpop.f32.mrf.mxu1 }
 0xcbe   :  { %v1241_v0 = vpop.eup %1240 }
 0xcbf   :  { %v519_v42 = vadd.f32 1.0, %v1241_v0 }
 0xcc1   :  { %1242 = vrcp.f32 %v519_v42  ;;  %v531_v9 = vand.u32 2147483648, %v519_v42  ;;  %v529_v10 = vand.u32 2147483647, %v519_v42  ;;  %vm525_vm15 = vweird.f32 %v519_v42 }
 0xcc3   :  { %v532_v13 = vor.u32 1.1754944e-38, %v531_v9  ;;  %vm530_vm1 = vcmp.eq.f32.partialorder %v529_v10, 8.507059e+37 }
 0xcc7   :  { %v1243_v1 = vpop.eup %1242 }
 0xcc8   :  { %v521_v7 = vmul.f32 %v1243_v1, %v519_v42  ;;  %vm526_vm14 = vweird.f32 %v1243_v1 }
 0xcc9   :  { %vm527_vm0 = vmor %vm525_vm15, %vm526_vm14 }
 0xcca   :  { %v522_v43 = vsub.f32 1.0, %v521_v7 }
 0xccc   :  { %v523_v44 = vmul.f32 %v1243_v1, %v522_v43 }
 0xcce   :  { %v524_v11 = vadd.f32 %v1243_v1, %v523_v44 }
 0xcd0   :  { %v528_v15 = vsel %vm527_vm0, %v1243_v1, %v524_v11 }
 0xcd1   :  { %v533_v46 = vsel %vm530_vm1, %v532_v13, %v528_v15 }
 0xcd2   :  { %v539_v47 = vmul.f32 %v537_v45, %v533_v46  ;;  %v546_v53 = vsub.f32 1.0, %v533_v46  ;;  %v552_v55 = vmul.f32 %v533_v46, %v1582_v63 }
 0xcd4   :  { %541 = vrot.lane.b32.xlu0 %v539_v47, %s1329_s19 }
 0xd46   :  { %v542_v49 = vpop.permute.xlu0 %541 }
 0xd47   :  { %v544_v51 = vadd.f32 %v542_v49, %v511_v38 }
 0xd49   :  { %1244 = vtanh.f32 %v544_v51 }
 0xd4f   :  { %v1245_v52 = vpop.eup %1244 }
 0xd50   :  { %548 = vrot.lane.b32.xlu1 %v1245_v52, %s1330_s3 }
 0xdc2   :  { %v549_v54 = vpop.permute.xlu1 %548 }
 0xdc3   :  { %v551_v57 = vmul.f32 %v549_v54, %v546_v53 }
 0xdc5   :  { %v1619_v60 = vadd.f32 %v552_v55, %v551_v57 }
 0xdc7   :  { %v554_v61 = vpack.c.bf16 %v1619_v60, %v1619_v60 }
 0xdc9   :  { %556 = vrot.lane.b32.xlu0 %v554_v61, %s1330_s3 }
 0xe3b   :  { %v557_v56 = vpop.permute.xlu0 %556 }
 0xe3c   :  { %1180 = vmatmul.msk.bf16.vlgmr.msrb.gmra.mxu3 %vm128_vm2, %v557_v56  ;;  %1181 = vmatmul.msk.bf16.vlgmr.msrb.gmra.mxu0 %vm128_vm2, %v557_v56 }
 0xe3d   :  { %805 = vmatpush.bf16.msrb.mxu3 %v1482_v48  ;;  %818 = vmatpush.bf16.msrb.mxu0 %v1381_v4 }
 0xe41   :  { %806 = vmatpush.bf16.msrb.mxu3 %v1488_v50  ;;  %819 = vmatpush.bf16.msrb.mxu0 %v1397_v8 }
 0xeb9   :  { %v583_v63 = vpop.f32.mrf.mxu0 }
 0xeba   :  { %v584_v20 = vadd.f32 %v583_v63, %v1467_v22 }
 0xebf   :  { %v570_v3 = vpop.f32.mrf.mxu3 }
 0xec0   :  { %v1631_v5 = vadd.f32 %v570_v3, %v1511_v59 }
 0xec1   :  { %v585_v58 = vpop.f32.mrf.mxu0 }
 0xec2   :  { %v587_v12 = vsel %vm229_vm7, %v1631_v5, -inf }
 0xec3   :  { %588 = vmax.xlane.f32.xlu2 %v587_v12 }
 0xec7   :  { %v572_v19 = vpop.f32.mrf.mxu3 }
 0xedb   :  { %655 = vrot.lane.b32.xlu2 %v584_v20, %s1329_s19 }
 0xf36   :  { %v1637_v21 = vpop.xlane.xlu2 %588 }
 0xf37   :  { %vm590_vm3 = vcmp.ge.f32.partialorder %v1631_v5, %v1637_v21 }
 0xf38   :  { %v591_v23 = vsel %vm590_vm3, %v1429_v14, 128 }
 0xf39   :  { %v592_v25 = vsel %vm229_vm7, %v591_v23, 2147483647 }
 0xf3a   :  { %v594_v26 = vshra.s32 %v592_v25, 16  ;;  %v593_v28 = vand.u32 65535, %v592_v25 }
 0xf3c   :  { %v596_v27 = vcvt.s32.f32 %v594_v26  ;;  %v595_v30 = vcvt.s32.f32 %v593_v28 }
 0xf3e   :  { %597 = vmin.xlane.f32.xlu1 %v596_v27  ;;  %v656_v15 = vpop.permute.xlu2 %655 }
 0xfb1   :  { %v598_v29 = vpop.xlane.xlu1 %597 }
 0xfb2   :  { %vm599_vm4 = vcmp.eq.f32.partialorder %v596_v27, %v598_v29  ;;  %v604_v32 = vcvt.f32.s32 %v598_v29 }
 0xfb3   :  { %v600_v31 = vsel %vm599_vm4, %v595_v30, inf }
 0xfb4   :  { %601 = vmin.xlane.f32.xlu0 %v600_v31  ;;  %v605_v34 = vshll.u32 %v604_v32, 16 }
0x1027   :  { %v602_v33 = vpop.xlane.xlu0 %601 }
0x1028   :  { %v603_v35 = vcvt.f32.s32 %v602_v33 }
0x102a   :  { %v606_v36 = vadd.s32 %v605_v34, %v603_v35 }
0x102c   :  { %vm617_vm5 = vcmp.eq.s32.totalorder %v1429_v14, %v606_v36 }
0x102d   :  { %vm1183_vm6 = vmpackc.low %vm617_vm5, %vm617_vm5 }
0x102e   :  { %1184 = vmatmul.msk.bf16.vlgmr.msrb.gmra.mxu2 %vm1183_vm6, %v1328_v16 }
0x10b1   :  { %v630_v37 = vpop.f32.mrf.mxu2 }
0x10b2   :  { %v634_v38 = vadd.f32 %v630_v37, %v584_v20 }
0x10b4   :  { %v1185_v39 = vmul.f32 -1.442695, %v634_v38 }
0x10b6   :  { %1246 = vpow2.f32 %v1185_v39 }
0x10b9   :  { %v632_v40 = vpop.f32.mrf.mxu2 }
0x10bc   :  { %v1247_v41 = vpop.eup %1246 }
0x10bd   :  { %v638_v0 = vadd.f32 1.0, %v1247_v41 }
0x10bf   :  { %1248 = vrcp.f32 %v638_v0  ;;  %v650_v43 = vand.u32 2147483648, %v638_v0  ;;  %v648_v44 = vand.u32 2147483647, %v638_v0  ;;  %vm644_vm9 = vweird.f32 %v638_v0 }
0x10c1   :  { %v651_v11 = vor.u32 1.1754944e-38, %v650_v43  ;;  %vm649_vm11 = vcmp.eq.f32.partialorder %v648_v44, 8.507059e+37 }
0x10c5   :  { %v1249_v42 = vpop.eup %1248 }
0x10c6   :  { %v640_v1 = vmul.f32 %v1249_v42, %v638_v0  ;;  %vm645_vm8 = vweird.f32 %v1249_v42 }
0x10c7   :  { %vm646_vm10 = vmor %vm644_vm9, %vm645_vm8 }
0x10c8   :  { %v641_v7 = vsub.f32 1.0, %v640_v1 }
0x10ca   :  { %v642_v9 = vmul.f32 %v1249_v42, %v641_v7 }
0x10cc   :  { %v643_v10 = vadd.f32 %v1249_v42, %v642_v9 }
0x10ce   :  { %v647_v13 = vsel %vm646_vm10, %v1249_v42, %v643_v10 }
0x10cf   :  { %v652_v45 = vsel %vm649_vm11, %v651_v11, %v647_v13 }
0x10d0   :  { %v658_v46 = vmul.f32 %v656_v15, %v652_v45  ;;  %v665_v52 = vsub.f32 1.0, %v652_v45  ;;  %v671_v54 = vmul.f32 %v652_v45, %v1619_v60 }
0x10d2   :  { %660 = vrot.lane.b32.xlu1 %v658_v46, %s1329_s19 }
0x1144   :  { %v661_v47 = vpop.permute.xlu1 %660 }
0x1145   :  { %v663_v49 = vadd.f32 %v661_v47, %v630_v37 }
0x1147   :  { %1250 = vtanh.f32 %v663_v49 }
0x114d   :  { %v1251_v51 = vpop.eup %1250 }
0x114e   :  { %667 = vrot.lane.b32.xlu0 %v1251_v51, %s1330_s3 }
0x11c0   :  { %v668_v53 = vpop.permute.xlu0 %667 }
0x11c1   :  { %v670_v55 = vmul.f32 %v668_v53, %v665_v52 }
0x11c3   :  { %v1648_v57 = vadd.f32 %v671_v54, %v670_v55 }
0x11c5   :  { %v673_v61 = vpack.c.bf16 %v1648_v57, %v1648_v57 }
0x11c7   :  { %675 = vrot.lane.b32.xlu2 %v673_v61, %s1330_s3 }
0x1221   :  { %v676_v56 = vpop.permute.xlu2 %675 }
0x1222   :  { %1186 = vmatmul.msk.bf16.vlgmr.msra.gmra.mxu3 %vm128_vm2, %v676_v56  ;;  %1187 = vmatmul.msk.bf16.vlgmr.msra.gmra.mxu0 %vm128_vm2, %v676_v56 }
0x1223   :  { %924 = vmatpush.bf16.msra.mxu3 %v1482_v48  ;;  %937 = vmatpush.bf16.msra.mxu0 %v1381_v4 }
0x1227   :  { %925 = vmatpush.bf16.msra.mxu3 %v1488_v50  ;;  %938 = vmatpush.bf16.msra.mxu0 %v1397_v8 }
0x129f   :  { %v702_v60 = vpop.f32.mrf.mxu0 }
0x12a0   :  { %v703_v20 = vadd.f32 %v702_v60, %v1467_v22 }
0x12a5   :  { %v689_v63 = vpop.f32.mrf.mxu3 }
0x12a6   :  { %v1660_v3 = vadd.f32 %v689_v63, %v1511_v59 }
0x12a7   :  { %v704_v58 = vpop.f32.mrf.mxu0 }
0x12a8   :  { %v706_v12 = vsel %vm229_vm7, %v1660_v3, -inf }
0x12a9   :  { %707 = vmax.xlane.f32.xlu0 %v706_v12 }
0x12ad   :  { %v691_v19 = vpop.f32.mrf.mxu3 }
0x12bd   :  { %774 = vrot.lane.b32.xlu0 %v703_v20, %s1329_s19 }
0x131c   :  { %v1666_v4 = vpop.xlane.xlu0 %707 }
0x131d   :  { %vm709_vm12 = vcmp.ge.f32.partialorder %v1660_v3, %v1666_v4 }
0x131e   :  { %v710_v8 = vsel %vm709_vm12, %v1429_v14, 128 }
0x131f   :  { %v711_v23 = vsel %vm229_vm7, %v710_v8, 2147483647 }
0x1320   :  { %v713_v25 = vshra.s32 %v711_v23, 16  ;;  %v712_v27 = vand.u32 65535, %v711_v23 }
0x1322   :  { %v715_v26 = vcvt.s32.f32 %v713_v25  ;;  %v714_v29 = vcvt.s32.f32 %v712_v27 }
0x1324   :  { %716 = vmin.xlane.f32.xlu1 %v715_v26 }
0x132f   :  { %v775_v13 = vpop.permute.xlu0 %774 }
0x1397   :  { %v717_v28 = vpop.xlane.xlu1 %716 }
0x1398   :  { %vm718_vm13 = vcmp.eq.f32.partialorder %v715_v26, %v717_v28  ;;  %v723_v31 = vcvt.f32.s32 %v717_v28 }
0x1399   :  { %v719_v30 = vsel %vm718_vm13, %v714_v29, inf }
0x139a   :  { %720 = vmin.xlane.f32.xlu2 %v719_v30  ;;  %v724_v33 = vshll.u32 %v723_v31, 16 }
0x140d   :  { %v721_v32 = vpop.xlane.xlu2 %720 }
0x140e   :  { %v722_v34 = vcvt.f32.s32 %v721_v32 }
0x1410   :  { %v725_v35 = vadd.s32 %v724_v33, %v722_v34 }
0x1412   :  { %vm736_vm14 = vcmp.eq.s32.totalorder %v1429_v14, %v725_v35 }
0x1413   :  { %vm1189_vm15 = vmpackc.low %vm736_vm14, %vm736_vm14 }
0x1414   :  { %1190 = vmatmul.msk.bf16.vlgmr.msra.gmra.mxu1 %vm1189_vm15, %v1328_v16 }
0x1491   :  { %v749_v36 = vpop.f32.mrf.mxu1 }
0x1492   :  { %v753_v37 = vadd.f32 %v749_v36, %v703_v20 }
0x1494   :  { %v1191_v38 = vmul.f32 -1.442695, %v753_v37 }
0x1496   :  { %1252 = vpow2.f32 %v1191_v38 }
0x1499   :  { %v751_v39 = vpop.f32.mrf.mxu1 }
0x149c   :  { %v1253_v40 = vpop.eup %1252 }
0x149d   :  { %v757_v41 = vadd.f32 1.0, %v1253_v40 }
0x149f   :  { %1254 = vrcp.f32 %v757_v41  ;;  %v769_v7 = vand.u32 2147483648, %v757_v41  ;;  %v767_v9 = vand.u32 2147483647, %v757_v41  ;;  %vm763_vm1 = vweird.f32 %v757_v41 }
0x14a1   :  { %v770_v10 = vor.u32 1.1754944e-38, %v769_v7  ;;  %vm768_vm4 = vcmp.eq.f32.partialorder %v767_v9, 8.507059e+37 }
0x14a5   :  { %v1255_v0 = vpop.eup %1254 }
0x14a6   :  { %v759_v42 = vmul.f32 %v1255_v0, %v757_v41  ;;  %vm764_vm0 = vweird.f32 %v1255_v0 }
0x14a7   :  { %vm765_vm3 = vmor %vm763_vm1, %vm764_vm0 }
0x14a8   :  { %v760_v1 = vsub.f32 1.0, %v759_v42 }
0x14aa   :  { %v761_v43 = vmul.f32 %v1255_v0, %v760_v1 }
0x14ac   :  { %v762_v44 = vadd.f32 %v1255_v0, %v761_v43 }
0x14ae   :  { %v766_v11 = vsel %vm765_vm3, %v1255_v0, %v762_v44 }
0x14af   :  { %v771_v15 = vsel %vm768_vm4, %v770_v10, %v766_v11 }
0x14b0   :  { %v777_v45 = vmul.f32 %v775_v13, %v771_v15  ;;  %v784_v51 = vsub.f32 1.0, %v771_v15  ;;  %v790_v53 = vmul.f32 %v771_v15, %v1648_v57 }
0x14b2   :  { %779 = vrot.lane.b32.xlu2 %v777_v45, %s1329_s19 }
0x150c   :  { %v780_v46 = vpop.permute.xlu2 %779 }
0x150d   :  { %v782_v47 = vadd.f32 %v780_v46, %v749_v36 }
0x150f   :  { %1256 = vtanh.f32 %v782_v47 }
0x1515   :  { %v1257_v49 = vpop.eup %1256 }
0x1516   :  { %786 = vrot.lane.b32.xlu1 %v1257_v49, %s1330_s3 }
0x1588   :  { %v787_v52 = vpop.permute.xlu1 %786 }
0x1589   :  { %v789_v54 = vmul.f32 %v787_v52, %v784_v51 }
0x158b   :  { %v1677_v55 = vadd.f32 %v790_v53, %v789_v54 }
0x158d   :  { %v792_v61 = vpack.c.bf16 %v1677_v55, %v1677_v55 }
0x158f   :  { %794 = vrot.lane.b32.xlu0 %v792_v61, %s1330_s3 }
0x1601   :  { %v795_v56 = vpop.permute.xlu0 %794 }
0x1602   :  { %1192 = vmatmul.msk.bf16.vlgmr.msrb.gmra.mxu3 %vm128_vm2, %v795_v56  ;;  %1193 = vmatmul.msk.bf16.vlgmr.msrb.gmra.mxu0 %vm128_vm2, %v795_v56 }
0x1603   :  { %1043 = vmatpush.bf16.msrb.mxu3 %v1482_v48 }
0x1607   :  { %1044 = vmatpush.bf16.msrb.mxu3 %v1488_v50 }
0x167f   :  { %v821_v60 = vpop.f32.mrf.mxu0 }
0x1680   :  { %v822_v20 = vadd.f32 %v821_v60, %v1467_v22 }
0x1685   :  { %v808_v63 = vpop.f32.mrf.mxu3 }
0x1686   :  { %v1687_v57 = vadd.f32 %v808_v63, %v1511_v59 }
0x1687   :  { %v823_v58 = vpop.f32.mrf.mxu0 }
0x1688   :  { %v825_v12 = vsel %vm229_vm7, %v1687_v57, -inf }
0x1689   :  { %826 = vmax.xlane.f32.xlu2 %v825_v12 }
0x168d   :  { %v810_v19 = vpop.f32.mrf.mxu3 }
0x16a1   :  { %893 = vrot.lane.b32.xlu2 %v822_v20, %s1329_s19 }
0x16fc   :  { %v1693_v8 = vpop.xlane.xlu2 %826 }
0x16fd   :  { %vm828_vm5 = vcmp.ge.f32.partialorder %v1687_v57, %v1693_v8 }
0x16fe   :  { %v829_v48 = vsel %vm828_vm5, %v1429_v14, 128 }
0x16ff   :  { %v830_v50 = vsel %vm229_vm7, %v829_v48, 2147483647 }
0x1700   :  { %v832_v23 = vshra.s32 %v830_v50, 16  ;;  %v831_v26 = vand.u32 65535, %v830_v50 }
0x1702   :  { %v834_v25 = vcvt.s32.f32 %v832_v23  ;;  %v833_v28 = vcvt.s32.f32 %v831_v26 }
0x1704   :  { %835 = vmin.xlane.f32.xlu0 %v834_v25  ;;  %v894_v11 = vpop.permute.xlu2 %893 }
0x1777   :  { %v836_v27 = vpop.xlane.xlu0 %835 }
0x1778   :  { %vm837_vm6 = vcmp.eq.f32.partialorder %v834_v25, %v836_v27  ;;  %v842_v30 = vcvt.f32.s32 %v836_v27 }
0x1779   :  { %v838_v29 = vsel %vm837_vm6, %v833_v28, inf }
0x177a   :  { %839 = vmin.xlane.f32.xlu1 %v838_v29  ;;  %v843_v32 = vshll.u32 %v842_v30, 16 }
0x17ed   :  { %v840_v31 = vpop.xlane.xlu1 %839 }
0x17ee   :  { %v841_v33 = vcvt.f32.s32 %v840_v31 }
0x17f0   :  { %v844_v34 = vadd.s32 %v843_v32, %v841_v33 }
0x17f2   :  { %vm855_vm8 = vcmp.eq.s32.totalorder %v1429_v14, %v844_v34 }
0x17f3   :  { %vm1195_vm9 = vmpackc.low %vm855_vm8, %vm855_vm8 }
0x17f4   :  { %1196 = vmatmul.msk.bf16.vlgmr.msra.gmra.mxu2 %vm1195_vm9, %v1328_v16 }
0x1877   :  { %v868_v35 = vpop.f32.mrf.mxu2 }
0x1878   :  { %v872_v36 = vadd.f32 %v868_v35, %v822_v20 }
0x187a   :  { %v1197_v37 = vmul.f32 -1.442695, %v872_v36 }
0x187c   :  { %1258 = vpow2.f32 %v1197_v37 }
0x187f   :  { %v870_v38 = vpop.f32.mrf.mxu2 }
0x1882   :  { %v1259_v39 = vpop.eup %1258 }
0x1883   :  { %v876_v40 = vadd.f32 1.0, %v1259_v39 }
0x1885   :  { %1260 = vrcp.f32 %v876_v40  ;;  %v888_v1 = vand.u32 2147483648, %v876_v40  ;;  %v886_v43 = vand.u32 2147483647, %v876_v40  ;;  %vm882_vm11 = vweird.f32 %v876_v40 }
0x1887   :  { %v889_v44 = vor.u32 1.1754944e-38, %v888_v1  ;;  %vm887_vm13 = vcmp.eq.f32.partialorder %v886_v43, 8.507059e+37 }
0x188b   :  { %v1261_v41 = vpop.eup %1260 }
0x188c   :  { %v878_v0 = vmul.f32 %v1261_v41, %v876_v40  ;;  %vm883_vm10 = vweird.f32 %v1261_v41 }
0x188d   :  { %vm884_vm12 = vmor %vm882_vm11, %vm883_vm10 }
0x188e   :  { %v879_v42 = vsub.f32 1.0, %v878_v0 }
0x1890   :  { %v880_v7 = vmul.f32 %v1261_v41, %v879_v42 }
0x1892   :  { %v881_v9 = vadd.f32 %v1261_v41, %v880_v7 }
0x1894   :  { %v885_v10 = vsel %vm884_vm12, %v1261_v41, %v881_v9 }
0x1895   :  { %v890_v13 = vsel %vm887_vm13, %v889_v44, %v885_v10 }
0x1896   :  { %v896_v15 = vmul.f32 %v894_v11, %v890_v13  ;;  %v903_v49 = vsub.f32 1.0, %v890_v13  ;;  %v909_v52 = vmul.f32 %v890_v13, %v1677_v55  ;;  %v369_v13 = vsub.f32 %v1557_v2, %v1563_v18 }
0x1898   :  { %898 = vrot.lane.b32.xlu0 %v896_v15, %s1329_s19  ;;  %v370_v15 = vmul.f32 1.442695, %v369_v13 }
0x190a   :  { %v899_v45 = vpop.permute.xlu0 %898 }
0x190b   :  { %v901_v46 = vadd.f32 %v899_v45, %v868_v35 }
0x190d   :  { %1262 = vtanh.f32 %v901_v46 }
0x1913   :  { %v1263_v47 = vpop.eup %1262 }
0x1914   :  { %905 = vrot.lane.b32.xlu1 %v1263_v47, %s1330_s3 }
0x1986   :  { %v906_v51 = vpop.permute.xlu1 %905 }
0x1987   :  { %v908_v53 = vmul.f32 %v906_v51, %v903_v49 }
0x1989   :  { %v1704_v54 = vadd.f32 %v909_v52, %v908_v53 }
0x198b   :  { %v911_v61 = vpack.c.bf16 %v1704_v54, %v1704_v54 }
0x198d   :  { %913 = vrot.lane.b32.xlu0 %v911_v61, %s1330_s3 }
0x19ff   :  { %v914_v56 = vpop.permute.xlu0 %913 }
0x1a00   :  { %1198 = vmatmul.msk.bf16.vlgmr.msra.gmra.mxu3 %vm128_vm2, %v914_v56  ;;  %1199 = vmatmul.msk.bf16.vlgmr.msra.gmra.mxu0 %vm128_vm2, %v914_v56 }
0x1a7d   :  { %v940_v60 = vpop.f32.mrf.mxu0 }
0x1a7e   :  { %v941_v20 = vadd.f32 %v940_v60, %v1467_v22 }
0x1a83   :  { %v927_v63 = vpop.f32.mrf.mxu3 }
0x1a84   :  { %v1712_v58 = vadd.f32 %v927_v63, %v1511_v59 }
0x1a85   :  { %v942_v12 = vpop.f32.mrf.mxu0 }
0x1a86   :  { %v944_v55 = vsel %vm229_vm7, %v1712_v58, -inf  ;;  %v607_v12 = vsub.f32 %v1631_v5, %v1637_v21 }
0x1a87   :  { %945 = vmax.xlane.f32.xlu2 %v944_v55 }
0x1a88   :  { %v608_v55 = vmul.f32 1.442695, %v607_v12 }
0x1a8b   :  { %v929_v19 = vpop.f32.mrf.mxu3 }
0x1a8c   :  { %v250_v19 = vsub.f32 %v1514_v62, %v1520_v6 }
0x1a9f   :  { %1012 = vrot.lane.b32.xlu2 %v941_v20, %s1329_s19 }
0x1afa   :  { %v1718_v48 = vpop.xlane.xlu2 %945 }
0x1afb   :  { %vm947_vm14 = vcmp.ge.f32.partialorder %v1712_v58, %v1718_v48 }
0x1afc   :  { %v948_v50 = vsel %vm947_vm14, %v1429_v14, 128 }
0x1afd   :  { %v949_v23 = vsel %vm229_vm7, %v948_v50, 2147483647 }
0x1afe   :  { %v951_v25 = vshra.s32 %v949_v23, 16  ;;  %v950_v27 = vand.u32 65535, %v949_v23  ;;  %v964_v23 = vsub.f32 %v1712_v58, %v1718_v48 }
0x1b00   :  { %v953_v26 = vcvt.s32.f32 %v951_v25  ;;  %v952_v29 = vcvt.s32.f32 %v950_v27  ;;  %v965_v25 = vmul.f32 1.442695, %v964_v23 }
0x1b02   :  { %954 = vmin.xlane.f32.xlu1 %v953_v26  ;;  %v1013_v44 = vpop.permute.xlu2 %1012 }
0x1b75   :  { %v955_v28 = vpop.xlane.xlu1 %954 }
0x1b76   :  { %vm956_vm15 = vcmp.eq.f32.partialorder %v953_v26, %v955_v28  ;;  %v961_v22 = vcvt.f32.s32 %v955_v28 }
0x1b77   :  { %v957_v30 = vsel %vm956_vm15, %v952_v29, inf }
0x1b78   :  { %958 = vmin.xlane.f32.xlu0 %v957_v30  ;;  %v962_v32 = vshll.u32 %v961_v22, 16 }
0x1beb   :  { %v959_v31 = vpop.xlane.xlu0 %958 }
0x1bec   :  { %v960_v33 = vcvt.f32.s32 %v959_v31 }
0x1bee   :  { %v963_v34 = vadd.s32 %v962_v32, %v960_v33 }
0x1bf0   :  { %vm974_vm0 = vcmp.eq.s32.totalorder %v1429_v14, %v963_v34 }
0x1bf1   :  { %vm1201_vm1 = vmpackc.low %vm974_vm0, %vm974_vm0 }
0x1bf2   :  { %1202 = vmatmul.msk.bf16.vlgmr.msrb.gmra.mxu1 %vm1201_vm1, %v1328_v16 }
0x1c6f   :  { %v987_v35 = vpop.f32.mrf.mxu1 }
0x1c70   :  { %v991_v36 = vadd.f32 %v987_v35, %v941_v20  ;;  %v251_v20 = vmul.f32 1.442695, %v250_v19 }
0x1c72   :  { %v1203_v37 = vmul.f32 -1.442695, %v991_v36 }
0x1c74   :  { %1264 = vpow2.f32 %v1203_v37 }
0x1c77   :  { %v989_v38 = vpop.f32.mrf.mxu1 }
0x1c7a   :  { %v1265_v39 = vpop.eup %1264 }
0x1c7b   :  { %v995_v40 = vadd.f32 1.0, %v1265_v39 }
0x1c7d   :  { %1266 = vrcp.f32 %v995_v40  ;;  %v1007_v1 = vand.u32 2147483648, %v995_v40  ;;  %v1005_v43 = vand.u32 2147483647, %v995_v40  ;;  %vm1001_vm4 = vweird.f32 %v995_v40 }
0x1c7e   :  { %1268 = vpow2.f32 %v370_v15 }
0x1c7f   :  { %v1008_v14 = vor.u32 1.1754944e-38, %v1007_v1  ;;  %vm1006_vm6 = vcmp.eq.f32.partialorder %v1005_v43, 8.507059e+37 }
0x1c83   :  { %v1267_v41 = vpop.eup %1266 }
0x1c84   :  { %v997_v0 = vmul.f32 %v1267_v41, %v995_v40  ;;  %vm1002_vm3 = vweird.f32 %v1267_v41  ;;  %v1269_v45 = vpop.eup %1268 }
0x1c85   :  { %vm1003_vm5 = vmor %vm1001_vm4, %vm1002_vm3  ;;  %v372_v46 = vsel %vm229_vm7, %v1269_v45, 0.0 }
0x1c86   :  { %v998_v42 = vsub.f32 1.0, %v997_v0 }
0x1c88   :  { %v999_v7 = vmul.f32 %v1267_v41, %v998_v42  ;;  %v845_v42 = vsub.f32 %v1687_v57, %v1693_v8 }
0x1c8a   :  { %v1000_v9 = vadd.f32 %v1267_v41, %v999_v7  ;;  %v846_v1 = vmul.f32 1.442695, %v845_v42 }
0x1c8c   :  { %v1004_v16 = vsel %vm1003_vm5, %v1267_v41, %v1000_v9 }
0x1c8d   :  { %v1009_v10 = vsel %vm1006_vm6, %v1008_v14, %v1004_v16 }
0x1c8e   :  { %v1015_v11 = vmul.f32 %v1013_v44, %v1009_v10  ;;  %v1022_v52 = vsub.f32 1.0, %v1009_v10  ;;  %v1028_v61 = vmul.f32 %v1009_v10, %v1704_v54 }
0x1c90   :  { %1017 = vrot.lane.b32.xlu1 %v1015_v11, %s1329_s19  ;;  %v726_v11 = vsub.f32 %v1660_v3, %v1666_v4 }
0x1c92   :  { %v727_v15 = vmul.f32 1.442695, %v726_v11 }
0x1cba   :  { %373 = vadd.xlane.f32.xlu1 %v372_v46 }
0x1d02   :  { %v1018_v47 = vpop.permute.xlu1 %1017 }
0x1d03   :  { %v1020_v49 = vadd.f32 %v1018_v47, %v987_v35 }
0x1d05   :  { %1270 = vtanh.f32 %v1020_v49 }
0x1d06   :  { %1272 = vpow2.f32 %v608_v55 }
0x1d07   :  { %1274 = vpow2.f32 %v251_v20 }
0x1d08   :  { %1276 = vpow2.f32 %v965_v25 }
0x1d0b   :  { %v1271_v51 = vpop.eup %1270 }
0x1d0c   :  { %1024 = vrot.lane.b32.xlu0 %v1271_v51, %s1330_s3  ;;  %v1273_v50 = vpop.eup %1272 }
0x1d0d   :  { %v610_v54 = vsel %vm229_vm7, %v1273_v50, 0.0  ;;  %v1275_v26 = vpop.eup %1274 }
0x1d0e   :  { %v253_v27 = vsel %vm229_vm7, %v1275_v26, 0.0  ;;  %v1277_v28 = vpop.eup %1276 }
0x1d0f   :  { %v967_v29 = vsel %vm229_vm7, %v1277_v28, 0.0 }
0x1d2d   :  { %v374_v22 = vpop.xlane.xlu1 %373 }
0x1d2e   :  { %1278 = vlog2.f32 %v374_v22 }
0x1d34   :  { %v1279_v32 = vpop.eup %1278 }
0x1d35   :  { %v376_v33 = vmul.f32 0.6931472, %v1279_v32 }
0x1d37   :  { %v377_v35 = vadd.f32 %v376_v33, %v1563_v18 }
0x1d39   :  { %v378_v37 = vsub.f32 %v1557_v2, %v377_v35 }
0x1d3b   :  { %v1064_v40 = vrot.slane %v378_v37, 4 }
0x1d7e   :  { %v1025_v53 = vpop.permute.xlu0 %1024 }
0x1d7f   :  { %v1027_v56 = vmul.f32 %v1025_v53, %v1022_v52 }
0x1d81   :  { %v1029_v60 = vadd.f32 %v1028_v61, %v1027_v56 }
0x1d83   :  { %v1030_v63 = vpack.c.bf16 %v1029_v60, %v1029_v60 }
0x1d85   :  { %1032 = vrot.lane.b32.xlu2 %v1030_v63, %s1330_s3 }
0x1dae   :  { %611 = vadd.xlane.f32.xlu2 %v610_v54 }
0x1db6   :  { %254 = vadd.xlane.f32.xlu2 %v253_v27 }
0x1dbe   :  { %968 = vadd.xlane.f32.xlu2 %v967_v29 }
0x1ddf   :  { %v1033_v30 = vpop.permute.xlu2 %1032 }
0x1de0   :  { %1204 = vmatmul.msk.bf16.vlgmr.msrb.gmra.mxu3 %vm128_vm2, %v1033_v30  ;;  %vm1087_vm2 = vcmask 257024  }
0x1e21   :  { %v612_v31 = vpop.xlane.xlu2 %611 }
0x1e29   :  { %v255_v34 = vpop.xlane.xlu2 %254 }
0x1e2a   :  { %1280 = vlog2.f32 %v255_v34 }
0x1e2b   :  { %1282 = vpow2.f32 %v846_v1 }
0x1e30   :  { %v1281_v36 = vpop.eup %1280 }
0x1e31   :  { %v257_v38 = vmul.f32 0.6931472, %v1281_v36  ;;  %v1283_v43 = vpop.eup %1282 }
0x1e32   :  { %v848_v14 = vsel %vm229_vm7, %v1283_v43, 0.0 }
0x1e33   :  { %v258_v39 = vadd.f32 %v257_v38, %v1520_v6  ;;  %v488_v6 = vsub.f32 %v1594_v17, %v1600_v24 }
0x1e35   :  { %v259_v41 = vsub.f32 %v1514_v62, %v258_v39  ;;  %v489_v2 = vmul.f32 1.442695, %v488_v6 }
0x1e37   :  { %v1075_v0 = vsel %vm229_vm7, %v259_v41, %v1064_v40  ;;  %1284 = vpow2.f32 %v489_v2 }
0x1e38   :  { %1079 = vst [vmem:[%s1798_s4] sm:$0xff] %v1075_v0 }
0x1e3d   :  { %v1285_v16 = vpop.eup %1284 }
0x1e3e   :  { %v491_v44 = vsel %vm229_vm7, %v1285_v16, 0.0 }
0x1e63   :  { %v1046_v18 = vpop.f32.mrf.mxu3 }
0x1e64   :  { %v1754_v7 = vadd.f32 %v1046_v18, %v1511_v59 }
0x1e66   :  { %v1050_v62 = vsel %vm229_vm7, %v1754_v7, -inf }
0x1e67   :  { %1051 = vmax.xlane.f32.xlu0 %v1050_v62 }
0x1e6b   :  { %v1048_v9 = vpop.f32.mrf.mxu3 }
0x1e6f   :  { %849 = vadd.xlane.f32.xlu0 %v848_v14 }
0x1e77   :  { %492 = vadd.xlane.f32.xlu0 %v491_v44 }
0x1e8b   :  { %1084 = vrot.lane.b32.xlu0 %v1029_v60, %s1330_s3 }
0x1eda   :  { %v1052_v59 = vpop.xlane.xlu0 %1051 }
0x1edb   :  { %v1053_v10 = vsub.f32 %v1754_v7, %v1052_v59 }
0x1edd   :  { %v1054_v13 = vmul.f32 1.442695, %v1053_v10 }
0x1edf   :  { %1286 = vpow2.f32 %v1054_v13 }
0x1ee0   :  { %1288 = vlog2.f32 %v612_v31 }
0x1ee1   :  { %1290 = vpow2.f32 %v727_v15 }
0x1ee2   :  { %v850_v45 = vpop.xlane.xlu0 %849 }
0x1ee5   :  { %v1287_v46 = vpop.eup %1286 }
0x1ee6   :  { %v1056_v47 = vsel %vm229_vm7, %v1287_v46, 0.0  ;;  %v1289_v49 = vpop.eup %1288 }
0x1ee7   :  { %1057 = vadd.xlane.f32.xlu1 %v1056_v47  ;;  %v614_v51 = vmul.f32 0.6931472, %v1289_v49  ;;  %v1291_v53 = vpop.eup %1290 }
0x1ee8   :  { %v729_v56 = vsel %vm229_vm7, %v1291_v53, 0.0 }
0x1ee9   :  { %v615_v61 = vadd.f32 %v614_v51, %v1637_v21 }
0x1eea   :  { %v493_v52 = vpop.xlane.xlu0 %492 }
0x1eeb   :  { %1292 = vlog2.f32 %v493_v52  ;;  %v616_v63 = vsub.f32 %v1631_v5, %v615_v61 }
0x1eed   :  { %v1067_v19 = vrot.slane %v616_v63, 4 }
0x1eef   :  { %730 = vadd.xlane.f32.xlu1 %v729_v56 }
0x1ef1   :  { %v1293_v60 = vpop.eup %1292 }
0x1ef2   :  { %v495_v12 = vmul.f32 0.6931472, %v1293_v60 }
0x1ef4   :  { %v496_v55 = vadd.f32 %v495_v12, %v1600_v24  ;;  %v969_v24 = vpop.xlane.xlu2 %968 }
0x1ef5   :  { %1294 = vlog2.f32 %v969_v24 }
0x1ef6   :  { %v497_v20 = vsub.f32 %v1594_v17, %v496_v55  ;;  %1296 = vlog2.f32 %v850_v45 }
0x1ef8   :  { %v1076_v50 = vsel %vm229_vm7, %v497_v20, %v1067_v19 }
0x1ef9   :  { %1080 = vst [vmem:[%s1798_s4 + $0x8] sm:$0xff] %v1076_v50 }
0x1efb   :  { %v1295_v21 = vpop.eup %1294 }
0x1efc   :  { %v1297_v23 = vpop.eup %1296  ;;  %v971_v54 = vmul.f32 0.6931472, %v1295_v21 }
0x1efd   :  { %v1085_v5 = vpop.permute.xlu0 %1084  ;;  %v852_v26 = vmul.f32 0.6931472, %v1297_v23 }
0x1efe   :  { %1088 = vst.msk [vmem:[#allocation2] sm:$0xf] %vm1087_vm2, %v1085_v5  ;;  %v972_v29 = vadd.f32 %v971_v54, %v1718_v48 }
0x1eff   :  { %1101 = dma.vmem_to_hbm [thread:$0]  %s1097_s8, 64, %s1099_s11, [#allocation3]   ;;  %v853_v22 = vadd.f32 %v852_v26, %v1693_v8 }
0x1f00   :  { %v973_v32 = vsub.f32 %v1712_v58, %v972_v29 }
0x1f01   :  { %v854_v35 = vsub.f32 %v1687_v57, %v853_v22 }
0x1f03   :  { %v1070_v38 = vrot.slane %v854_v35, 4 }
0x1f5a   :  { %v1058_v17 = vpop.xlane.xlu1 %1057 }
0x1f5b   :  { %1298 = vlog2.f32 %v1058_v17 }
0x1f61   :  { %v1299_v25 = vpop.eup %1298 }
0x1f62   :  { %v1060_v27 = vmul.f32 0.6931472, %v1299_v25  ;;  %v731_v28 = vpop.xlane.xlu1 %730 }
0x1f63   :  { %1300 = vlog2.f32 %v731_v28 }
0x1f64   :  { %v1061_v30 = vadd.f32 %v1060_v27, %v1052_v59 }
0x1f66   :  { %v1062_v31 = vsub.f32 %v1754_v7, %v1061_v30 }
0x1f68   :  { %v1073_v33 = vrot.slane %v1062_v31, 4 }
0x1f69   :  { %v1301_v34 = vpop.eup %1300 }
0x1f6a   :  { %v1078_v36 = vsel %vm229_vm7, %v973_v32, %v1073_v33  ;;  %v733_v37 = vmul.f32 0.6931472, %v1301_v34 }
0x1f6b   :  { %1082 = vst [vmem:[%s1798_s4 + $0x18] sm:$0xff] %v1078_v36 }
0x1f6c   :  { %v734_v48 = vadd.f32 %v733_v37, %v1666_v4 }
0x1f6e   :  { %v735_v8 = vsub.f32 %v1660_v3, %v734_v48 }
0x1f70   :  { %v1077_v39 = vsel %vm229_vm7, %v735_v8, %v1070_v38 }
0x1f71   :  { %1081 = vst [vmem:[%s1798_s4 + $0x10] sm:$0xff] %v1077_v39 }
0x1f72   :  { %1326 = dma.done.wait [#allocation3], 64  }
0x1f73   :  { %1327 = vsyncadd [#allocation3], 4294967232 }
0x1f74   :  { %1108 = vsyncpa [#allocation3], 1 }

</bundles_post_ra>
